<compile_context>
chip_gen: v6e
topology: v6e:2x2x1
jax: 0.10.0
libtpu: 0.0.40
codegen_flags: <defaults>
</compile_context>

<pallas_src>
import jax
import jax.numpy as jnp
from jax import lax
from jax.experimental import pallas as pl
from jax.experimental.pallas import tpu as pltpu


# ----------------------------------------------------------------------------
# Kernel
# ----------------------------------------------------------------------------
def _make_find_kernel(nb, Lq, Lk, Dq, Dk, Mid, H, precise, flatten_att, flatten_val):
    mxu_dtype = jnp.float32 if precise else jnp.bfloat16

    def kernel(q_ref, k_ref, mask_ref,
               w1q_ref, b1q_ref, w2q_ref, b2q_ref,
               w1k_ref, b1k_ref, w2k_ref, b2k_ref,
               att_ref, val_ref):
        # Fold the batch dim into the MXU M dimension for the two MLPs.
        q2 = q_ref[...].reshape(nb * Lq, Dq).astype(mxu_dtype)
        k2 = k_ref[...].reshape(nb * Lk, Dk).astype(mxu_dtype)

        def mlp(x, w1_ref, b1_ref, w2_ref, b2_ref):
            h = jnp.dot(x, w1_ref[...].astype(mxu_dtype),
                        preferred_element_type=jnp.float32) + b1_ref[...]
            h = jnp.maximum(h, 0.0)
            return jnp.dot(h.astype(mxu_dtype), w2_ref[...].astype(mxu_dtype),
                           preferred_element_type=jnp.float32) + b2_ref[...]

        hq = mlp(q2, w1q_ref, b1q_ref, w2q_ref, b2q_ref).reshape(nb, Lq, H)
        hk = mlp(k2, w1k_ref, b1k_ref, w2k_ref, b2k_ref).reshape(nb, Lk, H)

        # F.normalize(p=2, dim=1): L2 over the *sequence* axis, per batch.
        # x * rsqrt(max(sumsq, eps^2)) == x / max(||x||, eps)   (eps = 1e-12)
        qn = hq * lax.rsqrt(jnp.maximum(jnp.sum(hq * hq, axis=1, keepdims=True),
                                        jnp.float32(1e-24)))
        kn = hk * lax.rsqrt(jnp.maximum(jnp.sum(hk * hk, axis=1, keepdims=True),
                                        jnp.float32(1e-24)))

        # Batched scores, contraction on the last dim of both operands.
        # TODO(synk): verify via pl.lower_as_mlir that this RHS-transposed form
        # lowers without an XLU relayout of kn; if it does relayout, keep kn in
        # (nb, H, Lk) once and feed the standard (M,K)x(K,N) form instead.
        scores = lax.dot_general(
            qn.astype(mxu_dtype), kn.astype(mxu_dtype),
            dimension_numbers=(((2,), (2,)), ((0,), (0,))),
            preferred_element_type=jnp.float32)

        # masked_fill(mask == 1, -1e32), done in-kernel on the VPU.
        scores = jnp.where(mask_ref[...] == 1, jnp.float32(-1e32), scores)

        # Softmax over dim=1 (the query axis).
        smax = jnp.max(scores, axis=1, keepdims=True)
        e = jnp.exp(scores - smax)
        denom = jnp.sum(e, axis=1, keepdims=True)
        if precise:
            att = e / denom
        else:
            att = e * pl.reciprocal(denom, approx=True)

        if flatten_att:
            att_ref[...] = att.reshape(nb, Lq * Lk)   # lane-dense store
        else:
            att_ref[...] = att

        # value = att_map @ key_normalized : (nb, Lq, Lk) x (nb, Lk, H)
        val = lax.dot_general(
            att.astype(mxu_dtype), kn.astype(mxu_dtype),
            dimension_numbers=(((2,), (1,)), ((0,), (0,))),
            preferred_element_type=jnp.float32)
        if flatten_val:
            val_ref[...] = val.reshape(nb, Lq * H)    # lane-dense store
        else:
            val_ref[...] = val

    return kernel


# ----------------------------------------------------------------------------
# Hardware query / VMEM budgeting / batch-block selection
# ----------------------------------------------------------------------------
def _tpu_vmem_and_cores():
    vmem_cap = 64 << 20           # conservative fallback (v7x-sized)
    multi_core = True             # conservative: keep >=2 grid steps
    try:
        vmem_cap = int(pltpu.get_tpu_info().vmem_capacity_bytes)
    except Exception:
        pass
    try:
        kind = jax.devices()[0].device_kind.lower()
        # v5e / v6e ("lite") chips have a single TensorCore.
        if ("lite" in kind) or ("v5e" in kind) or ("v6e" in kind):
            multi_core = False
    except Exception:
        pass
    return vmem_cap, multi_core


def _vmem_estimate_bytes(nb, Lq, Lk, Dq, Dk, Mid, H, weight_bufs=1):
    f = 4  # conservative: assume f32 everywhere
    io = 2 * f * nb * (Lq * Dq + Lk * Dk + Lk + Lq * Lk + Lq * H)   # double-buffered I/O
    w = weight_bufs * f * (Dq * Mid + Dk * Mid + 2 * Mid * H + 2 * Mid + 2 * H)
    tmp = f * nb * (Lq * Mid + Lk * Mid + 2 * (Lq * H + Lk * H) + 2 * Lq * Lk)
    return io + w + tmp


def _pick_block_b(B, Lq, Lk, Dq, Dk, Mid, H, *, budget_bytes, multi_core):
    # Enough folded rows to fill a 256-wide MXU M dimension (v6e / v7x).
    target = pl.cdiv(256, max(1, min(Lq, Lk)))
    divisors = [d for d in range(1, B + 1) if B % d == 0]
    feasible = [d for d in divisors
                if _vmem_estimate_bytes(d, Lq, Lk, Dq, Dk, Mid, H) <= budget_bytes]
    if not feasible:
        # TODO(synk): prime/odd B with no feasible divisor degrades to block_b=1;
        # padding B would be faster but needs masked rows downstream.
        return 1
    if multi_core and B >= 2:
        # Keep >= 2 grid steps so dimension_semantics=("parallel",) can use both TCs.
        pool = [d for d in feasible if B // d >= 2] or feasible
    else:
        pool = feasible
    geq = [d for d in pool if d >= target]
    return min(geq) if geq else max(pool)


# ----------------------------------------------------------------------------
# Wrapper
# ----------------------------------------------------------------------------
def find_module_pallas(query, key, mask, params, *, block_b=None, precise=True):
    B, Lq, Dq = query.shape
    _, Lk, Dk = key.shape
    Mid = params["w1q"].shape[1]
    H = params["w2q"].shape[1]

    vmem_cap, multi_core = _tpu_vmem_and_cores()
    budget = (vmem_cap * 3) // 4          # ~96 MiB on 128-MiB chips, 48 MiB on v7x

    if block_b is None:
        block_b = _pick_block_b(B, Lq, Lk, Dq, Dk, Mid, H,
                                budget_bytes=budget, multi_core=multi_core)
    assert B % block_b == 0, "block_b must divide the batch size"
    nb = block_b
    grid = (B // nb,)

    # Raw mask → (B, 1, Lk) int32; the -1e32 fill happens inside the kernel.
    if mask is None:
        mask = jnp.zeros((B, Lk), dtype=jnp.int32)
    mask3 = mask.reshape(B, 1, Lk).astype(jnp.int32)

    if not precise:
        # Halve HBM traffic for activations/weights; MXU accumulates in f32.
        query = query.astype(jnp.bfloat16)
        key = key.astype(jnp.bfloat16)
        params = dict(params)
        for name in ("w1q", "w2q", "w1k", "w2k"):
            params[name] = params[name].astype(jnp.bfloat16)

    # Lane-dense output packing (full unmasked vst) when the natural last dim
    # is not a multiple of 128 lanes.  Only when the 2-D block satisfies the
    # (8, 128) block-shape rule (nb == B or nb % 8 == 0).
    ok_2d = (nb == B) or (nb % 8 == 0)
    flatten_att = (Lk % 128 != 0) and ok_2d
    flatten_val = (H % 128 != 0) and ok_2d

    kernel = _make_find_kernel(nb, Lq, Lk, Dq, Dk, Mid, H,
                               precise, flatten_att, flatten_val)

    # TODO(synk): Lq/Lk not multiples of the sublane pack make the in-kernel
    # (nb,L,D)<->(nb*L,D) reshapes non-free; padding them is a perf-only change
    # (softmax over dim=1 makes query padding non-trivial), so it is skipped.

    def run(single_buffer_weights):
        # Constant-index weight blocks never re-DMA; single-buffer them.
        wkw = dict(pipeline_mode=pl.Buffered(1)) if single_buffer_weights else {}
        in_specs = [
            pl.BlockSpec((nb, Lq, Dq), lambda b: (b, 0, 0)),   # query
            pl.BlockSpec((nb, Lk, Dk), lambda b: (b, 0, 0)),   # key
            pl.BlockSpec((nb, 1, Lk), lambda b: (b, 0, 0)),    # mask
            pl.BlockSpec((Dq, Mid), lambda b: (0, 0), **wkw),  # w1q
            pl.BlockSpec((1, Mid), lambda b: (0, 0), **wkw),   # b1q
            pl.BlockSpec((Mid, H), lambda b: (0, 0), **wkw),   # w2q
            pl.BlockSpec((1, H), lambda b: (0, 0), **wkw),     # b2q
            pl.BlockSpec((Dk, Mid), lambda b: (0, 0), **wkw),  # w1k
            pl.BlockSpec((1, Mid), lambda b: (0, 0), **wkw),   # b1k
            pl.BlockSpec((Mid, H), lambda b: (0, 0), **wkw),   # w2k
            pl.BlockSpec((1, H), lambda b: (0, 0), **wkw),     # b2k
        ]
        if flatten_att:
            att_spec = pl.BlockSpec((nb, Lq * Lk), lambda b: (b, 0))
            att_shape = jax.ShapeDtypeStruct((B, Lq * Lk), jnp.float32)
        else:
            att_spec = pl.BlockSpec((nb, Lq, Lk), lambda b: (b, 0, 0))
            att_shape = jax.ShapeDtypeStruct((B, Lq, Lk), jnp.float32)
        if flatten_val:
            val_spec = pl.BlockSpec((nb, Lq * H), lambda b: (b, 0))
            val_shape = jax.ShapeDtypeStruct((B, Lq * H), jnp.float32)
        else:
            val_spec = pl.BlockSpec((nb, Lq, H), lambda b: (b, 0, 0))
            val_shape = jax.ShapeDtypeStruct((B, Lq, H), jnp.float32)

        weight_bufs = 1 if single_buffer_weights else 2
        est = _vmem_estimate_bytes(nb, Lq, Lk, Dq, Dk, Mid, H, weight_bufs=weight_bufs)
        vmem_limit = int(min(vmem_cap - (8 << 20),
                             max(budget + (8 << 20), int(est * 1.2), 32 << 20)))

        return pl.pallas_call(
            kernel,
            out_shape=[att_shape, val_shape],
            grid_spec=pltpu.PrefetchScalarGridSpec(
                num_scalar_prefetch=0,
                grid=grid,
                in_specs=in_specs,
                out_specs=[att_spec, val_spec],
            ),
            compiler_params=pltpu.CompilerParams(
                dimension_semantics=("parallel",),
                vmem_limit_bytes=vmem_limit,
            ),
        )(query, key, mask3,
          params["w1q"], params["b1q"], params["w2q"], params["b2q"],
          params["w1k"], params["b1k"], params["w2k"], params["b2k"])

    try:
        att_o, val_o = run(single_buffer_weights=True)
    except Exception:
        # Fallback for jax builds that reject pl.Buffered(1): default buffering.
        att_o, val_o = run(single_buffer_weights=False)

    if flatten_att:
        att_o = att_o.reshape(B, Lq, Lk)
    if flatten_val:
        val_o = val_o.reshape(B, Lq, H)
    return att_o, val_o


# ----------------------------------------------------------------------------
# Pure-JAX reference mirroring the PyTorch forward exactly
# (precise=False mirrors the bf16 MXU-input casts of the fast kernel path).
# ----------------------------------------------------------------------------
def find_module_ref(query, key, mask, params, *, precise=True):
    cast = (lambda x: x) if precise else (lambda x: x.astype(jnp.bfloat16))

    def mlp(x, w1, b1, w2, b2):
        h = jnp.dot(cast(x), cast(w1), preferred_element_type=jnp.float32) + b1
        h = jnp.maximum(h, 0.0)
        return jnp.dot(cast(h), cast(w2), preferred_element_type=jnp.float32) + b2

    q = mlp(query, params["w1q"], params["b1q"], params["w2q"], params["b2q"])
    k = mlp(key, params["w1k"], params["b1k"], params["w2k"], params["b2k"])

    def l2norm_dim1(x):
        n = jnp.sqrt(jnp.sum(x * x, axis=1, keepdims=True))
        return x / jnp.maximum(n, 1e-12)

    qn = l2norm_dim1(q)
    kn = l2norm_dim1(k)
    scores = jnp.einsum("bqh,bkh->bqk", cast(qn), cast(kn),
                        preferred_element_type=jnp.float32)
    scores = jnp.where(mask[:, None, :] == 1, jnp.float32(-1e32), scores)
    att = jax.nn.softmax(scores, axis=1)
    val = jnp.einsum("bqk,bkh->bqh", cast(att), cast(kn),
                     preferred_element_type=jnp.float32)
    return att, val


# ----------------------------------------------------------------------------
# Demo / self-test
# ----------------------------------------------------------------------------
if __name__ == "__main__":
    B, Lq, Lk = 8, 8, 8
    query_size, key_size, mlp_mid_size, hidden_size = 16, 16, 32, 32

    root = jax.random.PRNGKey(0)
    keys = jax.random.split(root, 10)

    query = jax.random.normal(keys[0], (B, Lq, query_size), dtype=jnp.float32)
    key_t = jax.random.normal(keys[1], (B, Lk, key_size), dtype=jnp.float32)
    # Mask: 1 means "mask out" (masked_fill with -1e32).
    mask = (jnp.zeros((B, Lk), dtype=jnp.int32)
            .at[0, Lk - 1].set(1)
            .at[3, 0].set(1))

    def lin(k_, fan_in, shape):
        return (jax.random.normal(k_, shape, dtype=jnp.float32)
                / jnp.sqrt(jnp.float32(fan_in)))

    params = {
        "w1q": lin(keys[2], query_size, (query_size, mlp_mid_size)),
        "b1q": lin(keys[3], query_size, (1, mlp_mid_size)),
        "w2q": lin(keys[4], mlp_mid_size, (mlp_mid_size, hidden_size)),
        "b2q": lin(keys[5], mlp_mid_size, (1, hidden_size)),
        "w1k": lin(keys[6], key_size, (key_size, mlp_mid_size)),
        "b1k": lin(keys[7], key_size, (1, mlp_mid_size)),
        "w2k": lin(keys[8], mlp_mid_size, (mlp_mid_size, hidden_size)),
        "b2k": lin(keys[9], mlp_mid_size, (1, hidden_size)),
    }

    # --- precise (all-f32) path: faithful to the PyTorch module at 1e-5 ---
    att_p, val_p = find_module_pallas(query, key_t, mask, params, precise=True)
    jax.block_until_ready((att_p, val_p))
    att_r, val_r = find_module_ref(query, key_t, mask, params, precise=True)
    assert att_p.shape == (B, Lq, Lk) and val_p.shape == (B, Lq, hidden_size)
    assert jnp.allclose(att_p, att_r, atol=1e-5, rtol=1e-5)
    assert jnp.allclose(val_p, val_r, atol=1e-5, rtol=1e-5)

    # --- fast path: bf16 MXU inputs (f32 accum) + approx softmax reciprocal ---
    att_f, val_f = find_module_pallas(query, key_t, mask, params, precise=False)
    jax.block_until_ready((att_f, val_f))
    att_fr, val_fr = find_module_ref(query, key_t, mask, params, precise=False)
    assert jnp.allclose(att_f, att_fr, atol=1e-2, rtol=1e-2)
    assert jnp.allclose(val_f, val_fr, atol=1e-2, rtol=1e-2)

    print("KERNEL_OK")
</pallas_src>

<mosaic_0001>
module attributes {stable_mosaic.version = 11 : i64} {
  func.func @kernel(%arg0: i32, %arg1: memref<4x8x16xf32, #tpu.memory_space<vmem>>, %arg2: memref<4x8x16xf32, #tpu.memory_space<vmem>>, %arg3: memref<4x1x8xi32, #tpu.memory_space<vmem>>, %arg4: memref<16x32xf32, #tpu.memory_space<vmem>>, %arg5: memref<1x32xf32, #tpu.memory_space<vmem>>, %arg6: memref<32x32xf32, #tpu.memory_space<vmem>>, %arg7: memref<1x32xf32, #tpu.memory_space<vmem>>, %arg8: memref<16x32xf32, #tpu.memory_space<vmem>>, %arg9: memref<1x32xf32, #tpu.memory_space<vmem>>, %arg10: memref<32x32xf32, #tpu.memory_space<vmem>>, %arg11: memref<1x32xf32, #tpu.memory_space<vmem>>, %arg12: memref<4x8x8xf32, #tpu.memory_space<vmem>>, %arg13: memref<4x8x32xf32, #tpu.memory_space<vmem>>) attributes {dimension_semantics = [#tpu.dimension_semantics<parallel>], iteration_bounds = array<i64: 2>, scalar_prefetch = 0 : i64, scratch_operands = 0 : i64, tpu.core_type = #tpu.core_type<tc>, window_params = [{transform_indices = @transform_0, window_bounds = array<i64: 4, 8, 16>}, {transform_indices = @transform_1, window_bounds = array<i64: 4, 8, 16>}, {transform_indices = @transform_2, window_bounds = array<i64: 4, 1, 8>}, {pipeline_mode = #tpu.pipeline_mode<synchronous>, transform_indices = @transform_3, window_bounds = array<i64: 16, 32>}, {pipeline_mode = #tpu.pipeline_mode<synchronous>, transform_indices = @transform_4, window_bounds = array<i64: 1, 32>}, {pipeline_mode = #tpu.pipeline_mode<synchronous>, transform_indices = @transform_5, window_bounds = array<i64: 32, 32>}, {pipeline_mode = #tpu.pipeline_mode<synchronous>, transform_indices = @transform_6, window_bounds = array<i64: 1, 32>}, {pipeline_mode = #tpu.pipeline_mode<synchronous>, transform_indices = @transform_7, window_bounds = array<i64: 16, 32>}, {pipeline_mode = #tpu.pipeline_mode<synchronous>, transform_indices = @transform_8, window_bounds = array<i64: 1, 32>}, {pipeline_mode = #tpu.pipeline_mode<synchronous>, transform_indices = @transform_9, window_bounds = array<i64: 32, 32>}, {pipeline_mode = #tpu.pipeline_mode<synchronous>, transform_indices = @transform_10, window_bounds = array<i64: 1, 32>}, {transform_indices = @transform_11, window_bounds = array<i64: 4, 8, 8>}, {transform_indices = @transform_12, window_bounds = array<i64: 4, 8, 32>}]} {
    %c0 = arith.constant 0 : index
    %c0_0 = arith.constant 0 : index
    %c0_1 = arith.constant 0 : index
    %0 = vector.load %arg1[%c0, %c0_0, %c0_1] : memref<4x8x16xf32, #tpu.memory_space<vmem>>, vector<4x8x16xf32>
    %1 = vector.shape_cast %0 : vector<4x8x16xf32> to vector<32x16xf32>
    %c0_2 = arith.constant 0 : index
    %c0_3 = arith.constant 0 : index
    %c0_4 = arith.constant 0 : index
    %2 = vector.load %arg2[%c0_2, %c0_3, %c0_4] : memref<4x8x16xf32, #tpu.memory_space<vmem>>, vector<4x8x16xf32>
    %3 = vector.shape_cast %2 : vector<4x8x16xf32> to vector<32x16xf32>
    %c0_5 = arith.constant 0 : index
    %c0_6 = arith.constant 0 : index
    %4 = vector.load %arg4[%c0_5, %c0_6] : memref<16x32xf32, #tpu.memory_space<vmem>>, vector<16x32xf32>
    %cst = arith.constant dense<0.000000e+00> : vector<32x32xf32>
    %5 = tpu.matmul %1, %4, %cst {dimension_numbers = #tpu.dot_dimension_numbers<[1], [0], [0], [1], [0, 0, 1, 1], [], []>} : vector<32x16xf32>, vector<16x32xf32>, vector<32x32xf32> -> vector<32x32xf32>
    %c0_7 = arith.constant 0 : index
    %c0_8 = arith.constant 0 : index
    %6 = vector.load %arg5[%c0_7, %c0_8] : memref<1x32xf32, #tpu.memory_space<vmem>>, vector<1x32xf32>
    %7 = vector.broadcast %6 : vector<1x32xf32> to vector<32x32xf32>
    %8 = arith.addf %5, %7 : vector<32x32xf32>
    %cst_9 = arith.constant 0.000000e+00 : f32
    %9 = vector.broadcast %cst_9 : f32 to vector<32x32xf32>
    %10 = arith.maximumf %8, %9 : vector<32x32xf32>
    %c0_10 = arith.constant 0 : index
    %c0_11 = arith.constant 0 : index
    %11 = vector.load %arg6[%c0_10, %c0_11] : memref<32x32xf32, #tpu.memory_space<vmem>>, vector<32x32xf32>
    %cst_12 = arith.constant dense<0.000000e+00> : vector<32x32xf32>
    %12 = tpu.matmul %10, %11, %cst_12 {dimension_numbers = #tpu.dot_dimension_numbers<[1], [0], [0], [1], [0, 0, 1, 1], [], []>} : vector<32x32xf32>, vector<32x32xf32>, vector<32x32xf32> -> vector<32x32xf32>
    %c0_13 = arith.constant 0 : index
    %c0_14 = arith.constant 0 : index
    %13 = vector.load %arg7[%c0_13, %c0_14] : memref<1x32xf32, #tpu.memory_space<vmem>>, vector<1x32xf32>
    %14 = vector.broadcast %13 : vector<1x32xf32> to vector<32x32xf32>
    %15 = arith.addf %12, %14 : vector<32x32xf32>
    %16 = vector.shape_cast %15 : vector<32x32xf32> to vector<4x8x32xf32>
    %c0_15 = arith.constant 0 : index
    %c0_16 = arith.constant 0 : index
    %17 = vector.load %arg8[%c0_15, %c0_16] : memref<16x32xf32, #tpu.memory_space<vmem>>, vector<16x32xf32>
    %cst_17 = arith.constant dense<0.000000e+00> : vector<32x32xf32>
    %18 = tpu.matmul %3, %17, %cst_17 {dimension_numbers = #tpu.dot_dimension_numbers<[1], [0], [0], [1], [0, 0, 1, 1], [], []>} : vector<32x16xf32>, vector<16x32xf32>, vector<32x32xf32> -> vector<32x32xf32>
    %c0_18 = arith.constant 0 : index
    %c0_19 = arith.constant 0 : index
    %19 = vector.load %arg9[%c0_18, %c0_19] : memref<1x32xf32, #tpu.memory_space<vmem>>, vector<1x32xf32>
    %20 = vector.broadcast %19 : vector<1x32xf32> to vector<32x32xf32>
    %21 = arith.addf %18, %20 : vector<32x32xf32>
    %cst_20 = arith.constant 0.000000e+00 : f32
    %22 = vector.broadcast %cst_20 : f32 to vector<32x32xf32>
    %23 = arith.maximumf %21, %22 : vector<32x32xf32>
    %c0_21 = arith.constant 0 : index
    %c0_22 = arith.constant 0 : index
    %24 = vector.load %arg10[%c0_21, %c0_22] : memref<32x32xf32, #tpu.memory_space<vmem>>, vector<32x32xf32>
    %cst_23 = arith.constant dense<0.000000e+00> : vector<32x32xf32>
    %25 = tpu.matmul %23, %24, %cst_23 {dimension_numbers = #tpu.dot_dimension_numbers<[1], [0], [0], [1], [0, 0, 1, 1], [], []>} : vector<32x32xf32>, vector<32x32xf32>, vector<32x32xf32> -> vector<32x32xf32>
    %c0_24 = arith.constant 0 : index
    %c0_25 = arith.constant 0 : index
    %26 = vector.load %arg11[%c0_24, %c0_25] : memref<1x32xf32, #tpu.memory_space<vmem>>, vector<1x32xf32>
    %27 = vector.broadcast %26 : vector<1x32xf32> to vector<32x32xf32>
    %28 = arith.addf %25, %27 : vector<32x32xf32>
    %29 = vector.shape_cast %28 : vector<32x32xf32> to vector<4x8x32xf32>
    %30 = arith.mulf %16, %16 : vector<4x8x32xf32>
    %cst_26 = arith.constant dense<0.000000e+00> : vector<4x32xf32>
    %31 = vector.multi_reduction <add>, %30, %cst_26 [1] : vector<4x8x32xf32> to vector<4x32xf32>
    %32 = vector.shape_cast %31 : vector<4x32xf32> to vector<4x1x32xf32>
    %cst_27 = arith.constant 1.000000e-24 : f32
    %33 = vector.broadcast %cst_27 : f32 to vector<4x1x32xf32>
    %34 = arith.maximumf %32, %33 : vector<4x1x32xf32>
    %35 = math.rsqrt %34 : vector<4x1x32xf32>
    %36 = vector.broadcast %35 : vector<4x1x32xf32> to vector<4x8x32xf32>
    %37 = arith.mulf %16, %36 : vector<4x8x32xf32>
    %38 = arith.mulf %29, %29 : vector<4x8x32xf32>
    %cst_28 = arith.constant dense<0.000000e+00> : vector<4x32xf32>
    %39 = vector.multi_reduction <add>, %38, %cst_28 [1] : vector<4x8x32xf32> to vector<4x32xf32>
    %40 = vector.shape_cast %39 : vector<4x32xf32> to vector<4x1x32xf32>
    %cst_29 = arith.constant 1.000000e-24 : f32
    %41 = vector.broadcast %cst_29 : f32 to vector<4x1x32xf32>
    %42 = arith.maximumf %40, %41 : vector<4x1x32xf32>
    %43 = math.rsqrt %42 : vector<4x1x32xf32>
    %44 = vector.broadcast %43 : vector<4x1x32xf32> to vector<4x8x32xf32>
    %45 = arith.mulf %29, %44 : vector<4x8x32xf32>
    %cst_30 = arith.constant dense<0.000000e+00> : vector<4x8x8xf32>
    %46 = tpu.matmul %37, %45, %cst_30 {dimension_numbers = #tpu.dot_dimension_numbers<[2], [2], [1], [1], [0, 0, 0, 1, 1, 1], [0], [0]>} : vector<4x8x32xf32>, vector<4x8x32xf32>, vector<4x8x8xf32> -> vector<4x8x8xf32>
    %c0_31 = arith.constant 0 : index
    %c0_32 = arith.constant 0 : index
    %c0_33 = arith.constant 0 : index
    %47 = vector.load %arg3[%c0_31, %c0_32, %c0_33] : memref<4x1x8xi32, #tpu.memory_space<vmem>>, vector<4x1x8xi32>
    %c1_i32 = arith.constant 1 : i32
    %48 = vector.broadcast %c1_i32 : i32 to vector<4x1x8xi32>
    %49 = arith.cmpi eq, %47, %48 : vector<4x1x8xi32>
    %cst_34 = arith.constant -1.000000e+32 : f32
    %50 = vector.shape_cast %49 : vector<4x1x8xi1> to vector<4x1x8xi1>
    %51 = vector.broadcast %50 : vector<4x1x8xi1> to vector<4x8x8xi1>
    %52 = vector.broadcast %cst_34 : f32 to vector<4x8x8xf32>
    %53 = arith.select %51, %52, %46 : vector<4x8x8xi1>, vector<4x8x8xf32>
    %cst_35 = arith.constant dense<0xFF800000> : vector<4x8xf32>
    %54 = vector.multi_reduction <maximumf>, %53, %cst_35 [1] : vector<4x8x8xf32> to vector<4x8xf32>
    %55 = vector.shape_cast %54 : vector<4x8xf32> to vector<4x1x8xf32>
    %56 = vector.broadcast %55 : vector<4x1x8xf32> to vector<4x8x8xf32>
    %57 = arith.subf %53, %56 : vector<4x8x8xf32>
    %58 = math.exp %57 : vector<4x8x8xf32>
    %cst_36 = arith.constant dense<0.000000e+00> : vector<4x8xf32>
    %59 = vector.multi_reduction <add>, %58, %cst_36 [1] : vector<4x8x8xf32> to vector<4x8xf32>
    %60 = vector.shape_cast %59 : vector<4x8xf32> to vector<4x1x8xf32>
    %61 = vector.broadcast %60 : vector<4x1x8xf32> to vector<4x8x8xf32>
    %62 = arith.divf %58, %61 : vector<4x8x8xf32>
    %c0_37 = arith.constant 0 : index
    %c0_38 = arith.constant 0 : index
    %c0_39 = arith.constant 0 : index
    %63 = vector.load %arg12[%c0_37, %c0_38, %c0_39] : memref<4x8x8xf32, #tpu.memory_space<vmem>>, vector<4x8x8xf32>
    tpu.vector_store %arg12[%c0_37, %c0_38, %c0_39], %62 {strides = array<i32>} : memref<4x8x8xf32, #tpu.memory_space<vmem>>, vector<4x8x8xf32>,
    %cst_40 = arith.constant dense<0.000000e+00> : vector<4x8x32xf32>
    %64 = tpu.matmul %62, %45, %cst_40 {dimension_numbers = #tpu.dot_dimension_numbers<[2], [1], [1], [2], [0, 0, 0, 1, 1, 2], [0], [0]>} : vector<4x8x8xf32>, vector<4x8x32xf32>, vector<4x8x32xf32> -> vector<4x8x32xf32>
    %c0_41 = arith.constant 0 : index
    %c0_42 = arith.constant 0 : index
    %c0_43 = arith.constant 0 : index
    %65 = vector.load %arg13[%c0_41, %c0_42, %c0_43] : memref<4x8x32xf32, #tpu.memory_space<vmem>>, vector<4x8x32xf32>
    tpu.vector_store %arg13[%c0_41, %c0_42, %c0_43], %64 {strides = array<i32>} : memref<4x8x32xf32, #tpu.memory_space<vmem>>, vector<4x8x32xf32>,
    return
  }
  func.func @transform_0(%arg0: i32) -> (i32, i32, i32) {
    %c0_i32 = arith.constant 0 : i32
    %c0_i32_0 = arith.constant 0 : i32
    %c0_i32_1 = arith.constant 0 : i32
    return %arg0, %c0_i32, %c0_i32_0 : i32, i32, i32
  }
  func.func @transform_1(%arg0: i32) -> (i32, i32, i32) {
    %c0_i32 = arith.constant 0 : i32
    %c0_i32_0 = arith.constant 0 : i32
    %c0_i32_1 = arith.constant 0 : i32
    return %arg0, %c0_i32, %c0_i32_0 : i32, i32, i32
  }
  func.func @transform_2(%arg0: i32) -> (i32, i32, i32) {
    %c0_i32 = arith.constant 0 : i32
    %c0_i32_0 = arith.constant 0 : i32
    %c0_i32_1 = arith.constant 0 : i32
    return %arg0, %c0_i32, %c0_i32_0 : i32, i32, i32
  }
  func.func @transform_3(%arg0: i32) -> (i32, i32) {
    %c0_i32 = arith.constant 0 : i32
    %c0_i32_0 = arith.constant 0 : i32
    %c0_i32_1 = arith.constant 0 : i32
    return %c0_i32, %c0_i32_0 : i32, i32
  }
  func.func @transform_4(%arg0: i32) -> (i32, i32) {
    %c0_i32 = arith.constant 0 : i32
    %c0_i32_0 = arith.constant 0 : i32
    %c0_i32_1 = arith.constant 0 : i32
    return %c0_i32, %c0_i32_0 : i32, i32
  }
  func.func @transform_5(%arg0: i32) -> (i32, i32) {
    %c0_i32 = arith.constant 0 : i32
    %c0_i32_0 = arith.constant 0 : i32
    %c0_i32_1 = arith.constant 0 : i32
    return %c0_i32, %c0_i32_0 : i32, i32
  }
  func.func @transform_6(%arg0: i32) -> (i32, i32) {
    %c0_i32 = arith.constant 0 : i32
    %c0_i32_0 = arith.constant 0 : i32
    %c0_i32_1 = arith.constant 0 : i32
    return %c0_i32, %c0_i32_0 : i32, i32
  }
  func.func @transform_7(%arg0: i32) -> (i32, i32) {
    %c0_i32 = arith.constant 0 : i32
    %c0_i32_0 = arith.constant 0 : i32
    %c0_i32_1 = arith.constant 0 : i32
    return %c0_i32, %c0_i32_0 : i32, i32
  }
  func.func @transform_8(%arg0: i32) -> (i32, i32) {
    %c0_i32 = arith.constant 0 : i32
    %c0_i32_0 = arith.constant 0 : i32
    %c0_i32_1 = arith.constant 0 : i32
    return %c0_i32, %c0_i32_0 : i32, i32
  }
  func.func @transform_9(%arg0: i32) -> (i32, i32) {
    %c0_i32 = arith.constant 0 : i32
    %c0_i32_0 = arith.constant 0 : i32
    %c0_i32_1 = arith.constant 0 : i32
    return %c0_i32, %c0_i32_0 : i32, i32
  }
  func.func @transform_10(%arg0: i32) -> (i32, i32) {
    %c0_i32 = arith.constant 0 : i32
    %c0_i32_0 = arith.constant 0 : i32
    %c0_i32_1 = arith.constant 0 : i32
    return %c0_i32, %c0_i32_0 : i32, i32
  }
  func.func @transform_11(%arg0: i32) -> (i32, i32, i32) {
    %c0_i32 = arith.constant 0 : i32
    %c0_i32_0 = arith.constant 0 : i32
    %c0_i32_1 = arith.constant 0 : i32
    return %arg0, %c0_i32, %c0_i32_0 : i32, i32, i32
  }
  func.func @transform_12(%arg0: i32) -> (i32, i32, i32) {
    %c0_i32 = arith.constant 0 : i32
    %c0_i32_0 = arith.constant 0 : i32
    %c0_i32_1 = arith.constant 0 : i32
    return %arg0, %c0_i32, %c0_i32_0 : i32, i32, i32
  }
}

module attributes {stable_mosaic.version = 11 : i64} {
  func.func @kernel(%arg0: i32, %arg1: memref<4x8x16xf32, #tpu.memory_space<vmem>>, %arg2: memref<4x8x16xf32, #tpu.memory_space<vmem>>, %arg3: memref<4x1x8xi32, #tpu.memory_space<vmem>>, %arg4: memref<16x32xf32, #tpu.memory_space<vmem>>, %arg5: memref<1x32xf32, #tpu.memory_space<vmem>>, %arg6: memref<32x32xf32, #tpu.memory_space<vmem>>, %arg7: memref<1x32xf32, #tpu.memory_space<vmem>>, %arg8: memref<16x32xf32, #tpu.memory_space<vmem>>, %arg9: memref<1x32xf32, #tpu.memory_space<vmem>>, %arg10: memref<32x32xf32, #tpu.memory_space<vmem>>, %arg11: memref<1x32xf32, #tpu.memory_space<vmem>>, %arg12: memref<4x8x8xf32, #tpu.memory_space<vmem>>, %arg13: memref<4x8x32xf32, #tpu.memory_space<vmem>>) attributes {dimension_semantics = [#tpu.dimension_semantics<parallel>], iteration_bounds = array<i64: 2>, scalar_prefetch = 0 : i64, scratch_operands = 0 : i64, tpu.core_type = #tpu.core_type<tc>, window_params = [{transform_indices = @transform_0, window_bounds = array<i64: 4, 8, 16>}, {transform_indices = @transform_1, window_bounds = array<i64: 4, 8, 16>}, {transform_indices = @transform_2, window_bounds = array<i64: 4, 1, 8>}, {pipeline_mode = #tpu.pipeline_mode<synchronous>, transform_indices = @transform_3, window_bounds = array<i64: 16, 32>}, {pipeline_mode = #tpu.pipeline_mode<synchronous>, transform_indices = @transform_4, window_bounds = array<i64: 1, 32>}, {pipeline_mode = #tpu.pipeline_mode<synchronous>, transform_indices = @transform_5, window_bounds = array<i64: 32, 32>}, {pipeline_mode = #tpu.pipeline_mode<synchronous>, transform_indices = @transform_6, window_bounds = array<i64: 1, 32>}, {pipeline_mode = #tpu.pipeline_mode<synchronous>, transform_indices = @transform_7, window_bounds = array<i64: 16, 32>}, {pipeline_mode = #tpu.pipeline_mode<synchronous>, transform_indices = @transform_8, window_bounds = array<i64: 1, 32>}, {pipeline_mode = #tpu.pipeline_mode<synchronous>, transform_indices = @transform_9, window_bounds = array<i64: 32, 32>}, {pipeline_mode = #tpu.pipeline_mode<synchronous>, transform_indices = @transform_10, window_bounds = array<i64: 1, 32>}, {transform_indices = @transform_11, window_bounds = array<i64: 4, 8, 8>}, {transform_indices = @transform_12, window_bounds = array<i64: 4, 8, 32>}]} {
    %c0 = arith.constant 0 : index
    %c0_0 = arith.constant 0 : index
    %c0_1 = arith.constant 0 : index
    %0 = vector.load %arg1[%c0, %c0_0, %c0_1] : memref<4x8x16xf32, #tpu.memory_space<vmem>>, vector<4x8x16xf32>
    %1 = vector.shape_cast %0 : vector<4x8x16xf32> to vector<32x16xf32>
    %c0_2 = arith.constant 0 : index
    %c0_3 = arith.constant 0 : index
    %c0_4 = arith.constant 0 : index
    %2 = vector.load %arg2[%c0_2, %c0_3, %c0_4] : memref<4x8x16xf32, #tpu.memory_space<vmem>>, vector<4x8x16xf32>
    %3 = vector.shape_cast %2 : vector<4x8x16xf32> to vector<32x16xf32>
    %c0_5 = arith.constant 0 : index
    %c0_6 = arith.constant 0 : index
    %4 = vector.load %arg4[%c0_5, %c0_6] : memref<16x32xf32, #tpu.memory_space<vmem>>, vector<16x32xf32>
    %cst = arith.constant dense<0.000000e+00> : vector<32x32xf32>
    %5 = tpu.matmul %1, %4, %cst {dimension_numbers = #tpu.dot_dimension_numbers<[1], [0], [0], [1], [0, 0, 1, 1], [], []>} : vector<32x16xf32>, vector<16x32xf32>, vector<32x32xf32> -> vector<32x32xf32>
    %c0_7 = arith.constant 0 : index
    %c0_8 = arith.constant 0 : index
    %6 = vector.load %arg5[%c0_7, %c0_8] : memref<1x32xf32, #tpu.memory_space<vmem>>, vector<1x32xf32>
    %7 = vector.broadcast %6 : vector<1x32xf32> to vector<32x32xf32>
    %8 = arith.addf %5, %7 : vector<32x32xf32>
    %cst_9 = arith.constant 0.000000e+00 : f32
    %9 = vector.broadcast %cst_9 : f32 to vector<32x32xf32>
    %10 = arith.maximumf %8, %9 : vector<32x32xf32>
    %c0_10 = arith.constant 0 : index
    %c0_11 = arith.constant 0 : index
    %11 = vector.load %arg6[%c0_10, %c0_11] : memref<32x32xf32, #tpu.memory_space<vmem>>, vector<32x32xf32>
    %cst_12 = arith.constant dense<0.000000e+00> : vector<32x32xf32>
    %12 = tpu.matmul %10, %11, %cst_12 {dimension_numbers = #tpu.dot_dimension_numbers<[1], [0], [0], [1], [0, 0, 1, 1], [], []>} : vector<32x32xf32>, vector<32x32xf32>, vector<32x32xf32> -> vector<32x32xf32>
    %c0_13 = arith.constant 0 : index
    %c0_14 = arith.constant 0 : index
    %13 = vector.load %arg7[%c0_13, %c0_14] : memref<1x32xf32, #tpu.memory_space<vmem>>, vector<1x32xf32>
    %14 = vector.broadcast %13 : vector<1x32xf32> to vector<32x32xf32>
    %15 = arith.addf %12, %14 : vector<32x32xf32>
    %16 = vector.shape_cast %15 : vector<32x32xf32> to vector<4x8x32xf32>
    %c0_15 = arith.constant 0 : index
    %c0_16 = arith.constant 0 : index
    %17 = vector.load %arg8[%c0_15, %c0_16] : memref<16x32xf32, #tpu.memory_space<vmem>>, vector<16x32xf32>
    %cst_17 = arith.constant dense<0.000000e+00> : vector<32x32xf32>
    %18 = tpu.matmul %3, %17, %cst_17 {dimension_numbers = #tpu.dot_dimension_numbers<[1], [0], [0], [1], [0, 0, 1, 1], [], []>} : vector<32x16xf32>, vector<16x32xf32>, vector<32x32xf32> -> vector<32x32xf32>
    %c0_18 = arith.constant 0 : index
    %c0_19 = arith.constant 0 : index
    %19 = vector.load %arg9[%c0_18, %c0_19] : memref<1x32xf32, #tpu.memory_space<vmem>>, vector<1x32xf32>
    %20 = vector.broadcast %19 : vector<1x32xf32> to vector<32x32xf32>
    %21 = arith.addf %18, %20 : vector<32x32xf32>
    %cst_20 = arith.constant 0.000000e+00 : f32
    %22 = vector.broadcast %cst_20 : f32 to vector<32x32xf32>
    %23 = arith.maximumf %21, %22 : vector<32x32xf32>
    %c0_21 = arith.constant 0 : index
    %c0_22 = arith.constant 0 : index
    %24 = vector.load %arg10[%c0_21, %c0_22] : memref<32x32xf32, #tpu.memory_space<vmem>>, vector<32x32xf32>
    %cst_23 = arith.constant dense<0.000000e+00> : vector<32x32xf32>
    %25 = tpu.matmul %23, %24, %cst_23 {dimension_numbers = #tpu.dot_dimension_numbers<[1], [0], [0], [1], [0, 0, 1, 1], [], []>} : vector<32x32xf32>, vector<32x32xf32>, vector<32x32xf32> -> vector<32x32xf32>
    %c0_24 = arith.constant 0 : index
    %c0_25 = arith.constant 0 : index
    %26 = vector.load %arg11[%c0_24, %c0_25] : memref<1x32xf32, #tpu.memory_space<vmem>>, vector<1x32xf32>
    %27 = vector.broadcast %26 : vector<1x32xf32> to vector<32x32xf32>
    %28 = arith.addf %25, %27 : vector<32x32xf32>
    %29 = vector.shape_cast %28 : vector<32x32xf32> to vector<4x8x32xf32>
    %30 = arith.mulf %16, %16 : vector<4x8x32xf32>
    %cst_26 = arith.constant dense<0.000000e+00> : vector<4x32xf32>
    %31 = vector.multi_reduction <add>, %30, %cst_26 [1] : vector<4x8x32xf32> to vector<4x32xf32>
    %32 = vector.shape_cast %31 : vector<4x32xf32> to vector<4x1x32xf32>
    %cst_27 = arith.constant 1.000000e-24 : f32
    %33 = vector.broadcast %cst_27 : f32 to vector<4x1x32xf32>
    %34 = arith.maximumf %32, %33 : vector<4x1x32xf32>
    %35 = math.rsqrt %34 : vector<4x1x32xf32>
    %36 = vector.broadcast %35 : vector<4x1x32xf32> to vector<4x8x32xf32>
    %37 = arith.mulf %16, %36 : vector<4x8x32xf32>
    %38 = arith.mulf %29, %29 : vector<4x8x32xf32>
    %cst_28 = arith.constant dense<0.000000e+00> : vector<4x32xf32>
    %39 = vector.multi_reduction <add>, %38, %cst_28 [1] : vector<4x8x32xf32> to vector<4x32xf32>
    %40 = vector.shape_cast %39 : vector<4x32xf32> to vector<4x1x32xf32>
    %cst_29 = arith.constant 1.000000e-24 : f32
    %41 = vector.broadcast %cst_29 : f32 to vector<4x1x32xf32>
    %42 = arith.maximumf %40, %41 : vector<4x1x32xf32>
    %43 = math.rsqrt %42 : vector<4x1x32xf32>
    %44 = vector.broadcast %43 : vector<4x1x32xf32> to vector<4x8x32xf32>
    %45 = arith.mulf %29, %44 : vector<4x8x32xf32>
    %cst_30 = arith.constant dense<0.000000e+00> : vector<4x8x8xf32>
    %46 = tpu.matmul %37, %45, %cst_30 {dimension_numbers = #tpu.dot_dimension_numbers<[2], [2], [1], [1], [0, 0, 0, 1, 1, 1], [0], [0]>} : vector<4x8x32xf32>, vector<4x8x32xf32>, vector<4x8x8xf32> -> vector<4x8x8xf32>
    %c0_31 = arith.constant 0 : index
    %c0_32 = arith.constant 0 : index
    %c0_33 = arith.constant 0 : index
    %47 = vector.load %arg3[%c0_31, %c0_32, %c0_33] : memref<4x1x8xi32, #tpu.memory_space<vmem>>, vector<4x1x8xi32>
    %c1_i32 = arith.constant 1 : i32
    %48 = vector.broadcast %c1_i32 : i32 to vector<4x1x8xi32>
    %49 = arith.cmpi eq, %47, %48 : vector<4x1x8xi32>
    %cst_34 = arith.constant -1.000000e+32 : f32
    %50 = vector.shape_cast %49 : vector<4x1x8xi1> to vector<4x1x8xi1>
    %51 = vector.broadcast %50 : vector<4x1x8xi1> to vector<4x8x8xi1>
    %52 = vector.broadcast %cst_34 : f32 to vector<4x8x8xf32>
    %53 = arith.select %51, %52, %46 : vector<4x8x8xi1>, vector<4x8x8xf32>
    %cst_35 = arith.constant dense<0xFF800000> : vector<4x8xf32>
    %54 = vector.multi_reduction <maximumf>, %53, %cst_35 [1] : vector<4x8x8xf32> to vector<4x8xf32>
    %55 = vector.shape_cast %54 : vector<4x8xf32> to vector<4x1x8xf32>
    %56 = vector.broadcast %55 : vector<4x1x8xf32> to vector<4x8x8xf32>
    %57 = arith.subf %53, %56 : vector<4x8x8xf32>
    %58 = math.exp %57 : vector<4x8x8xf32>
    %cst_36 = arith.constant dense<0.000000e+00> : vector<4x8xf32>
    %59 = vector.multi_reduction <add>, %58, %cst_36 [1] : vector<4x8x8xf32> to vector<4x8xf32>
    %60 = vector.shape_cast %59 : vector<4x8xf32> to vector<4x1x8xf32>
    %61 = vector.broadcast %60 : vector<4x1x8xf32> to vector<4x8x8xf32>
    %62 = arith.divf %58, %61 : vector<4x8x8xf32>
    %c0_37 = arith.constant 0 : index
    %c0_38 = arith.constant 0 : index
    %c0_39 = arith.constant 0 : index
    %63 = vector.load %arg12[%c0_37, %c0_38, %c0_39] : memref<4x8x8xf32, #tpu.memory_space<vmem>>, vector<4x8x8xf32>
    tpu.vector_store %arg12[%c0_37, %c0_38, %c0_39], %62 {strides = array<i32>} : memref<4x8x8xf32, #tpu.memory_space<vmem>>, vector<4x8x8xf32>,
    %cst_40 = arith.constant dense<0.000000e+00> : vector<4x8x32xf32>
    %64 = tpu.matmul %62, %45, %cst_40 {dimension_numbers = #tpu.dot_dimension_numbers<[2], [1], [1], [2], [0, 0, 0, 1, 1, 2], [0], [0]>} : vector<4x8x8xf32>, vector<4x8x32xf32>, vector<4x8x32xf32> -> vector<4x8x32xf32>
    %c0_41 = arith.constant 0 : index
    %c0_42 = arith.constant 0 : index
    %c0_43 = arith.constant 0 : index
    %65 = vector.load %arg13[%c0_41, %c0_42, %c0_43] : memref<4x8x32xf32, #tpu.memory_space<vmem>>, vector<4x8x32xf32>
    tpu.vector_store %arg13[%c0_41, %c0_42, %c0_43], %64 {strides = array<i32>} : memref<4x8x32xf32, #tpu.memory_space<vmem>>, vector<4x8x32xf32>,
    return
  }
  func.func @transform_0(%arg0: i32) -> (i32, i32, i32) {
    %c0_i32 = arith.constant 0 : i32
    %c0_i32_0 = arith.constant 0 : i32
    %c0_i32_1 = arith.constant 0 : i32
    return %arg0, %c0_i32, %c0_i32_0 : i32, i32, i32
  }
  func.func @transform_1(%arg0: i32) -> (i32, i32, i32) {
    %c0_i32 = arith.constant 0 : i32
    %c0_i32_0 = arith.constant 0 : i32
    %c0_i32_1 = arith.constant 0 : i32
    return %arg0, %c0_i32, %c0_i32_0 : i32, i32, i32
  }
  func.func @transform_2(%arg0: i32) -> (i32, i32, i32) {
    %c0_i32 = arith.constant 0 : i32
    %c0_i32_0 = arith.constant 0 : i32
    %c0_i32_1 = arith.constant 0 : i32
    return %arg0, %c0_i32, %c0_i32_0 : i32, i32, i32
  }
  func.func @transform_3(%arg0: i32) -> (i32, i32) {
    %c0_i32 = arith.constant 0 : i32
    %c0_i32_0 = arith.constant 0 : i32
    %c0_i32_1 = arith.constant 0 : i32
    return %c0_i32, %c0_i32_0 : i32, i32
  }
  func.func @transform_4(%arg0: i32) -> (i32, i32) {
    %c0_i32 = arith.constant 0 : i32
    %c0_i32_0 = arith.constant 0 : i32
    %c0_i32_1 = arith.constant 0 : i32
    return %c0_i32, %c0_i32_0 : i32, i32
  }
  func.func @transform_5(%arg0: i32) -> (i32, i32) {
    %c0_i32 = arith.constant 0 : i32
    %c0_i32_0 = arith.constant 0 : i32
    %c0_i32_1 = arith.constant 0 : i32
    return %c0_i32, %c0_i32_0 : i32, i32
  }
  func.func @transform_6(%arg0: i32) -> (i32, i32) {
    %c0_i32 = arith.constant 0 : i32
    %c0_i32_0 = arith.constant 0 : i32
    %c0_i32_1 = arith.constant 0 : i32
    return %c0_i32, %c0_i32_0 : i32, i32
  }
  func.func @transform_7(%arg0: i32) -> (i32, i32) {
    %c0_i32 = arith.constant 0 : i32
    %c0_i32_0 = arith.constant 0 : i32
    %c0_i32_1 = arith.constant 0 : i32
    return %c0_i32, %c0_i32_0 : i32, i32
  }
  func.func @transform_8(%arg0: i32) -> (i32, i32) {
    %c0_i32 = arith.constant 0 : i32
    %c0_i32_0 = arith.constant 0 : i32
    %c0_i32_1 = arith.constant 0 : i32
    return %c0_i32, %c0_i32_0 : i32, i32
  }
  func.func @transform_9(%arg0: i32) -> (i32, i32) {
    %c0_i32 = arith.constant 0 : i32
    %c0_i32_0 = arith.constant 0 : i32
    %c0_i32_1 = arith.constant 0 : i32
    return %c0_i32, %c0_i32_0 : i32, i32
  }
  func.func @transform_10(%arg0: i32) -> (i32, i32) {
    %c0_i32 = arith.constant 0 : i32
    %c0_i32_0 = arith.constant 0 : i32
    %c0_i32_1 = arith.constant 0 : i32
    return %c0_i32, %c0_i32_0 : i32, i32
  }
  func.func @transform_11(%arg0: i32) -> (i32, i32, i32) {
    %c0_i32 = arith.constant 0 : i32
    %c0_i32_0 = arith.constant 0 : i32
    %c0_i32_1 = arith.constant 0 : i32
    return %arg0, %c0_i32, %c0_i32_0 : i32, i32, i32
  }
  func.func @transform_12(%arg0: i32) -> (i32, i32, i32) {
    %c0_i32 = arith.constant 0 : i32
    %c0_i32_0 = arith.constant 0 : i32
    %c0_i32_1 = arith.constant 0 : i32
    return %arg0, %c0_i32, %c0_i32_0 : i32, i32, i32
  }
}

</mosaic_0001>

<bundles_post_ra>
// kernel: tpu_custom_call.1
= control target key start
LH: loop header
LB: loop body
LE: loop exit
PB: predicated region body
PF: predicated region fallthrough
CT: control target
= control target key end

     0   :  { %s3287_s0 = inlined_call_operand.hbm [shape: f32[8,8,16], index: 0, kind: input, shape index: {}]   ;;  %s3288_s1 = inlined_call_operand.hbm [shape: f32[8,8,16], index: 1, kind: input, shape index: {}]   ;;  %s3289_s2 = inlined_call_operand.hbm [shape: s32[8,1,8], index: 2, kind: input, shape index: {}]   ;;  %s3290_s3 = inlined_call_operand.hbm [shape: f32[16,32], index: 3, kind: input, shape index: {}]   ;;  %s3291_s4 = inlined_call_operand.vmem [shape: f32[1,32], index: 4, kind: input, shape index: {}]   ;;  %s3292_s5 = inlined_call_operand.hbm [shape: f32[32,32], index: 5, kind: input, shape index: {}]   ;;  %s3293_s6 = inlined_call_operand.vmem [shape: f32[1,32], index: 6, kind: input, shape index: {}]   ;;  %s3294_s7 = inlined_call_operand.hbm [shape: f32[16,32], index: 7, kind: input, shape index: {}]   ;;  %s3295_s8 = inlined_call_operand.vmem [shape: f32[1,32], index: 8, kind: input, shape index: {}]   ;;  %s3296_s9 = inlined_call_operand.hbm [shape: f32[32,32], index: 9, kind: input, shape index: {}]   ;;  %s3297_s10 = inlined_call_operand.vmem [shape: f32[1,32], index: 10, kind: input, shape index: {}]   ;;  %s3298_s11 = inlined_call_operand.hbm [shape: f32[8,8,8], index: 11, kind: output, shape index: {0}]   ;;  %s3299_s12 = inlined_call_operand.hbm [shape: f32[8,8,32], index: 12, kind: output, shape index: {1}]  }
   0x1   :  { %3320 = sst [smem:[#allocation28_spill]] %s3288_s1 }
   0x2   :  { %3321 = sst [smem:[#allocation29_spill]] %s3290_s3 }
   0x3   :  { %3322 = sst [smem:[#allocation30_spill]] %s3292_s5 }
   0x4   :  { %3323 = sst [smem:[#allocation31_spill]] %s3294_s7 }
   0x5   :  { %3324 = sst [smem:[#allocation32_spill]] %s3298_s11 }
   0x6   :  { %3325 = sst [smem:[#allocation33_spill]] %s3299_s12 }
   0x7   :  { %18 = vsyncpa [#allocation3], 0 }
   0x8   :  { %20 = vsyncpa [#allocation3 + $0x1], 0 }
   0x9   :  { %21 = vsyncpa [#allocation6], 0 }
   0xa   :  { %23 = vsyncpa [#allocation6 + $0x1], 0 }
   0xb   :  { %24 = vsyncpa [#allocation9], 0 }
   0xc   :  { %25 = vsyncpa [#allocation12], 0 }
   0xd   :  { %26 = vsyncpa [#allocation4], 0 }
   0xe   :  { %28 = vsyncpa [#allocation4 + $0x1], 0 }
   0xf   :  { %29 = vsyncpa [#allocation16], 0 }
  0x10   :  { %31 = vsyncpa [#allocation16 + $0x1], 0  ;;  %s2780_s21 = smov 0   ;;  %s2782_s22 = smov 0  }
  0x11   :  { %s2784_s23 = smov 0   ;;  %s2786_s24 = smov 0  }
  0x12 LB: > { %3326 = sst [smem:[#allocation23_spill]] %s2683_s21  ;;  %s2801_s25 = sadd.s32 4294967295, %s2695_s24   ;;  %s2695_s24 = sphi %s2786_s24, %s3363_s24   ;;  %s2691_s23 = sphi %s2784_s23, %s3365_s23   ;;  %s2687_s22 = sphi %s2782_s22, %s3367_s22   ;;  %s2683_s21 = sphi %s2780_s21, %s3366_s21  }
  0x13   : > { %3327 = sst [smem:[#allocation24_spill]] %s2691_s23  ;;  %s2055_s26 = sadd.s32 4294967294, %s2695_s24  }
  0x14   : > { %p57_p0 = scmp.ne.s32.totalorder %s2687_s22, %s2683_s21  ;;  %p3312_p1 = scmp.eq.s32.totalorder %s2801_s25, 0 }
  0x15   : > { %p301_p2 = scmp.eq.s32.totalorder %s2801_s25, 1  ;;  %p307_p3 = scmp.eq.s32.totalorder %s2055_s26, 1 }
  0x16   : > { %p2810_p4 = por %p3312_p1, %p57_p0  ;;  %p2056_p5 = scmp.ge.s32.totalorder %s2695_s24, 1 }
  0x17   : > { %p2815_p6 = por %p307_p3, %p57_p0  ;;  %p340_p7 = scmp.lt.s32.totalorder %s2695_s24, 3 }
  0x18   : > { %s3328_s27 = scalar_select %p2810_p4, 1, 0 }
  0x19   : > { %s3329_s28 = scalar_select %p2815_p6, 1, 0 }
  0x1a   : > { %p2820_p8 = pnand %p2056_p5, %p340_p7  ;;  %s2697_s30 = smov [#allocation8]  }
  0x1b   : > { %3330 = sst [smem:[#allocation25_spill]] %s3329_s28  ;;  %s352_s13 = sshll.u32 %s2697_s30, 4  ;;  %s353_s13 = int_to_ptr.vmem [resolvable:$true] %s352_s13 }
  0x1c   : > { %s3331_s29 = scalar_select %p2820_p8, 1, 0 }
  0x1d   : > { %p2284_p9 = pneg %p2820_p8  ;;  %s2698_s15 = smov [#allocation11]  }
  0x1e   : > { %s384_s16 = sshll.u32 %s2698_s15, 4  ;;  %s2412_s17 = scalar_lea.vmem %s353_s13, 256  ;;  %s385_s16 = int_to_ptr.vmem [resolvable:$true] %s384_s16 }
  0x1f   : > { %p2829_p11 = pnand %p2284_p9, %p3312_p1  ;;  %p2413_p13 = scmp.ne.s32.totalorder %s353_s13, %s2412_s17 }
  0x20   : > { %p2420_p5 = scmp.lt.s32.totalorder %s353_s13, %s353_s13  ;;  %p2421_p7 = scmp.lt.s32.totalorder %s2412_s17, %s2412_s17 }
  0x21   : > { %s3332_s14 = scalar_select %p2829_p11, 1, 0 }
  0x22   : > { %p3313_p12 = pneg %p2829_p11  ;;  %p2422_p10 = por %p2421_p7, %p2420_p5 }
  0x24   : > { %p2415_p0 = pnand %p2413_p13, %p3313_p12 }
  0x26   : > { %p2416_p3 = pneg %p2415_p0 }
  0x28   : > { %p2423_p9 = pnand %p2422_p10, %p2416_p3 }
  0x2a   : > { %2426 = shalt.err (!%p2423_p9)
}
  0x2b   : > { %s3300_s18 = smov 128   ;;  %s3302_s19 = smov 8  }
  0x2c   : > { %s3333_s3 = sld [smem:[#allocation29_spill]]  ;;  %s2438_s30 = scalar_lea.vmem %s385_s16, 256 }
  0x2d   : > { %p2439_p13 = scmp.ne.s32.totalorder %s385_s16, %s2438_s30  ;;  %p2446_p10 = scmp.lt.s32.totalorder %s385_s16, %s385_s16 }
  0x2e   : > { %p2447_p3 = scmp.lt.s32.totalorder %s2438_s30, %s2438_s30 }
  0x2f   : > { %p2441_p0 = pnand %p2439_p13, %p3313_p12 }
  0x30   : > { %p2448_p7 = por %p2447_p3, %p2446_p10 }
  0x31   : > { %p2442_p5 = pneg %p2441_p0 }
  0x32   : > { %2287 = dma.hbm_to_vmem [thread:$0]  (!%p2829_p11), %s3333_s3, 256, %s353_s13, [#allocation9], %s3300_s18, %s3300_s18, %s3302_s19  }
  0x33   : > { %p2449_p9 = pnand %p2448_p7, %p2442_p5 }
  0x35   : > { %2452 = shalt.err (!%p2449_p9)
}
  0x36   : > { %s3334_s7 = sld [smem:[#allocation31_spill]]  ;;  %s2858_s13 = sadd.s32 1, %s2695_s24  }
  0x37   : > { %3335 = sst [smem:[#allocation26_spill]] %s2858_s13  ;;  %s44_s20 = sadd.s32 1, %s2691_s23 }
  0x38   : > { %s41_s26 = ssub.s32 %s2695_s24, %s2858_s13  ;;  %p51_p13 = scmp.ne.s32.totalorder %s2691_s23, %s2687_s22 }
  0x39   : > { %p42_p0 = scmp.eq.s32.totalorder %s41_s26, 0  ;;  %p52_p5 = scmp.eq.s32.totalorder %s2695_s24, 0 }
  0x3a   : > { %p2868_p10 = por %p301_p2, %p51_p13  ;;  %p2318_p3 = scmp.lt.s32.totalorder %s2695_s24, 2 }
  0x3b   : > { %s2874_s15 = scalar_select %p42_p0, %s2691_s23, %s44_s20  }
  0x3c   : > { %2293 = dma.hbm_to_vmem [thread:$0]  (!%p2829_p11), %s3334_s7, 256, %s385_s16, [#allocation12], %s3300_s18, %s3300_s18, %s3302_s19  }
  0x3d   : > { %s3336_s30 = scalar_select %p2868_p10, 1, 0 }
  0x3e   : > { %3337 = sst [smem:[#allocation27_spill]] %s2874_s15  ;;  %p53_p7 = por %p52_p5, %p51_p13 }
  0x3f   : > { %s2877_s17 = sand.u32 1, %s2691_s23   ;;  %s3311_s18 = sshll.u32 %s2695_s24, 9 }
  0x40   : > { %s3310_s16 = sshll.u32 %s2877_s17, 5  ;;  %p2881_p9 = pnand %p2318_p3, %p53_p7 }
  0x41   : > { %s438_s26 = sand.u32 1, %s2695_s24   ;;  %s3339_s1 = sld [smem:[#allocation28_spill]] }
  0x42   : > { %s442_s20 = scalar_lea.vmem [#allocation5], %s3310_s16  ;;  %s2701_s23 = smov [#allocation10]  }
  0x43   : > { %s449_s15 = sshll.u32 %s442_s20, 4  ;;  %s2897_s28 = sshll.u32 %s2701_s23, 4  ;;  %s2895_s15 = int_to_ptr.vmem [resolvable:$true] %s449_s15  ;;  %s369_s28 = int_to_ptr.vmem [resolvable:$true] %s2897_s28 }
  0x44   : > { %s2899_s21 = scalar_lea.sflag [#allocation6], %s438_s26  ;;  %p2905_p13 = pneg %p2881_p9 }
  0x47   : > { %s2891_s13 = scalar_lea.hbm %s3339_s1, %s3311_s18  ;;  %s2458_s16 = scalar_lea.hbm %s3339_s1, 1024 }
  0x48   : > { %s2453_s12 = scalar_lea.hbm %s2891_s13, 512  ;;  %p2459_p3 = scmp.lt.s32.totalorder %s2891_s13, %s3339_s1 }
  0x49   : > { %p2454_p2 = scmp.ne.s32.totalorder %s2891_s13, %s2453_s12  ;;  %p2460_p7 = scmp.lt.s32.totalorder %s2458_s16, %s2453_s12 }
  0x4b   : > { %p2456_p0 = pnand %p2905_p13, %p2454_p2  ;;  %p2461_p1 = por %p2460_p7, %p2459_p3 }
  0x4d   : > { %p2457_p5 = pneg %p2456_p0 }
  0x4f   : > { %p2462_p12 = pnand %p2461_p1, %p2457_p5 }
  0x51   : > { %2465 = shalt.err (!%p2462_p12)
}
  0x52   : > { %s2466_s26 = scalar_lea.vmem %s2895_s15, 512  ;;  %s2702_s11 = smov [#allocation5]  }
  0x53   : > { %p2467_p6 = scmp.ne.s32.totalorder %s2895_s15, %s2466_s26  ;;  %s2471_s7 = sshll.u32 %s2702_s11, 4  ;;  %s2472_s7 = int_to_ptr.vmem [resolvable:$false] %s2471_s7 }
  0x54   : > { %s2473_s20 = scalar_lea.vmem %s2472_s7, 1024  ;;  %p2474_p10 = scmp.lt.s32.totalorder %s2895_s15, %s2472_s7 }
  0x55   : > { %p2469_p2 = pnand %p2467_p6, %p2905_p13  ;;  %p2475_p4 = scmp.lt.s32.totalorder %s2473_s20, %s2466_s26 }
  0x57   : > { %p2470_p0 = pneg %p2469_p2  ;;  %p2476_p8 = por %p2475_p4, %p2474_p10 }
  0x59   : > { %p2477_p11 = pnand %p2476_p8, %p2470_p0 }
  0x5b   : > { %2480 = shalt.err (!%p2477_p11)
}
  0x5c   : > { %s3341_s12 = smov 8   ;;  %s3342_s18 = smov 128  }
  0x5d   : > { %2303 = dma.hbm_to_vmem [thread:$0]  (!%p2881_p9), %s2891_s13, 512, %s2895_s15, %s2899_s21, %s3342_s18, %s3342_s18, %s3341_s12  }
  0x5e   : > { %s2492_s11 = scalar_lea.vmem %s369_s28, 512  ;;  %p3343_p6 = scmp.ne.s32.totalorder %s3332_s14, 0 }
  0x5f   : > { %p2493_p1 = scmp.ne.s32.totalorder %s369_s28, %s2492_s11  ;;  %p2500_p8 = scmp.lt.s32.totalorder %s369_s28, %s369_s28 }
  0x60   : > { %p3344_p12 = pneg %p3343_p6  ;;  %p2501_p11 = scmp.lt.s32.totalorder %s2492_s11, %s2492_s11 }
  0x62   : > { %p2495_p5 = pnand %p2493_p1, %p3344_p12  ;;  %p2502_p10 = por %p2501_p11, %p2500_p8 }
  0x64   : > { %p2496_p4 = pneg %p2495_p5 }
  0x66   : > { %p2503_p3 = pnand %p2502_p10, %p2496_p4 }
  0x68   : > { %2506 = shalt.err (!%p2503_p3)
}
  0x69   : > { %s3345_s5 = sld [smem:[#allocation30_spill]]  ;;  %s2703_s13 = smov [#allocation13]  }
  0x6a   : > { %s400_s15 = sshll.u32 %s2703_s13, 4  ;;  %p3346_p2 = pmov %p3344_p12  ;;  %s401_s15 = int_to_ptr.vmem [resolvable:$true] %s400_s15 }
  0x6b   : > { %s2518_s26 = scalar_lea.vmem %s401_s15, 512  ;;  %p2526_p12 = scmp.lt.s32.totalorder %s401_s15, %s401_s15 }
  0x6c   : > { %p2519_p7 = scmp.ne.s32.totalorder %s401_s15, %s2518_s26  ;;  %p2527_p5 = scmp.lt.s32.totalorder %s2518_s26, %s2518_s26 }
  0x6e   : > { %p2521_p0 = pnand %p2519_p7, %p3346_p2  ;;  %p2528_p4 = por %p2527_p5, %p2526_p12 }
  0x6f   : > { %2290 = dma.hbm_to_vmem [thread:$0]  (!%p3343_p6), %s3345_s5, 512, %s369_s28, [#allocation9], %s3342_s18, %s3342_s18, %s3341_s12  }
  0x70   : > { %p2522_p1 = pneg %p2521_p0 }
  0x72   : > { %p2529_p8 = pnand %p2528_p4, %p2522_p1 }
  0x74   : > { %2532 = shalt.err (!%p2529_p8)
}
  0x75   : > { %2296 = dma.hbm_to_vmem [thread:$0]  (!%p3343_p6), %s3296_s9, 512, %s401_s15, [#allocation12], %s3342_s18, %s3342_s18, %s3341_s12  }
  0x76   : > { %s3347_s20 = sshll.u32 %s2695_s24, 9  ;;  %s3348_s13 = sshll.u32 %s2877_s17, 5 }
  0x77   : > { %s2959_s23 = scalar_lea.hbm %s3287_s0, %s3347_s20  ;;  %s421_s14 = scalar_lea.vmem [#allocation2], %s3348_s13 }
  0x78   : > { %s428_s26 = sshll.u32 %s421_s14, 4  ;;  %s2068_s28 = sshll.u32 %s2877_s17, 2  ;;  %s2963_s26 = int_to_ptr.vmem [resolvable:$true] %s428_s26 }
  0x79   : > { %s418_s7 = scalar_lea.sflag [#allocation3], %s2877_s17  ;;  %s2533_s1 = scalar_lea.hbm %s2959_s23, 512 }
  0x7a   : > { %p2534_p11 = scmp.ne.s32.totalorder %s2959_s23, %s2533_s1  ;;  %s2538_s20 = scalar_lea.hbm %s3287_s0, 1024 }
  0x7b   : > { %p2539_p3 = scmp.lt.s32.totalorder %s2959_s23, %s3287_s0  ;;  %p2540_p7 = scmp.lt.s32.totalorder %s2538_s20, %s2533_s1 }
  0x7c   : > { %p2536_p6 = pnand %p2534_p11, %p2905_p13 }
  0x7d   : > { %p2541_p2 = por %p2540_p7, %p2539_p3 }
  0x7e   : > { %p2537_p10 = pneg %p2536_p6 }
  0x80   : > { %p2542_p0 = pnand %p2541_p2, %p2537_p10 }
  0x82   : > { %2545 = shalt.err (!%p2542_p0)
}
  0x83   : > { %s2546_s13 = scalar_lea.vmem %s2963_s26, 512  ;;  %s2704_s14 = smov [#allocation2]  }
  0x84   : > { %p2547_p1 = scmp.ne.s32.totalorder %s2963_s26, %s2546_s13  ;;  %s2551_s5 = sshll.u32 %s2704_s14, 4  ;;  %s2552_s5 = int_to_ptr.vmem [resolvable:$false] %s2551_s5 }
  0x85   : > { %s2553_s15 = scalar_lea.vmem %s2552_s5, 1024  ;;  %p2554_p4 = scmp.lt.s32.totalorder %s2963_s26, %s2552_s5 }
  0x86   : > { %p2549_p12 = pnand %p2547_p1, %p2905_p13  ;;  %p2555_p8 = scmp.lt.s32.totalorder %s2553_s15, %s2546_s13 }
  0x88   : > { %p2550_p5 = pneg %p2549_p12  ;;  %p2556_p11 = por %p2555_p8, %p2554_p4 }
  0x8a   : > { %p2557_p6 = pnand %p2556_p11, %p2550_p5 }
  0x8c   : > { %2560 = shalt.err (!%p2557_p6)
}
  0x8d   : > { %2300 = dma.hbm_to_vmem [thread:$0]  (!%p2881_p9), %s2959_s23, 512, %s2963_s26, %s418_s7, %s3342_s18, %s3342_s18, %s3341_s12  }
  0x8e   : > { %s2123_s1 = sshll.u32 %s2695_s24, 6  ;;  %s463_s13 = scalar_lea.vmem [#allocation7], %s2068_s28 }
  0x8f   : > { %s2994_s16 = scalar_lea.hbm %s3289_s2, %s2123_s1  ;;  %s470_s14 = sshll.u32 %s463_s13, 4  ;;  %s2998_s14 = int_to_ptr.vmem [resolvable:$true] %s470_s14 }
  0x90   : > { %s2561_s5 = scalar_lea.hbm %s2994_s16, 64  ;;  %s2566_s23 = scalar_lea.hbm %s3289_s2, 128 }
  0x91   : > { %p2562_p10 = scmp.ne.s32.totalorder %s2994_s16, %s2561_s5  ;;  %p2567_p2 = scmp.lt.s32.totalorder %s2994_s16, %s3289_s2 }
  0x92   : > { %p2568_p0 = scmp.lt.s32.totalorder %s2566_s23, %s2561_s5 }
  0x93   : > { %p2564_p3 = pnand %p2562_p10, %p2905_p13 }
  0x94   : > { %p2569_p1 = por %p2568_p0, %p2567_p2 }
  0x95   : > { %p2565_p7 = pneg %p2564_p3 }
  0x97   : > { %p2570_p12 = pnand %p2569_p1, %p2565_p7 }
  0x99   : > { %2573 = shalt.err (!%p2570_p12)
}
  0x9a   : > { %s2574_s17 = scalar_lea.vmem %s2998_s14, 64  ;;  %s2705_s28 = smov [#allocation7]  }
  0x9b   : > { %p2575_p5 = scmp.ne.s32.totalorder %s2998_s14, %s2574_s17  ;;  %s2579_s15 = sshll.u32 %s2705_s28, 4  ;;  %s2580_s15 = int_to_ptr.vmem [resolvable:$false] %s2579_s15 }
  0x9c   : > { %s2581_s1 = scalar_lea.vmem %s2580_s15, 128  ;;  %p2582_p11 = scmp.lt.s32.totalorder %s2998_s14, %s2580_s15 }
  0x9d   : > { %p2577_p4 = pnand %p2575_p5, %p2905_p13  ;;  %p2583_p6 = scmp.lt.s32.totalorder %s2581_s1, %s2574_s17 }
  0x9f   : > { %p2578_p8 = pneg %p2577_p4  ;;  %p2584_p10 = por %p2583_p6, %p2582_p11 }
  0xa1   : > { %p2585_p3 = pnand %p2584_p10, %p2578_p8 }
  0xa3   : > { %2588 = shalt.err (!%p2585_p3)
}
  0xa4   : > { %s2706_s20 = smov 16   ;;  %s2707_s11 = smov 1  }
  0xa5   : > { %2306 = dma.hbm_to_vmem [thread:$0]  (!%p2881_p9), %s2994_s16, 64, %s2998_s14, %s2899_s21, %s2706_s20, %s2706_s20, %s2707_s11  }
  0xa6   : > { %p3349_p13 = scmp.ne.s32.totalorder %s3331_s29, 0 }
  0xa7   : > { %s3024_s3 = sand.u32 (!%p3349_p13), 1, %s2687_s22   ;;  %p3350_p7 = scmp.ne.s32.totalorder (!%p3349_p13), %s3328_s27, 0 }
  0xa8   : > { %482 = sbr.rel (%p3349_p13) target bundleno = 1099 (0x44b), region = 64  ;;  %s3027_s13 = sshll.u32 (!%p3349_p13), %s3024_s3, 5 }
  0xa9   : > { %s485_s5 = scalar_lea.sflag (!%p3349_p13), [#allocation3], %s3024_s3  ;;  %s488_s12 = scalar_lea.vmem (!%p3349_p13), [#allocation2], %s3027_s13 }
  0xad   : > { %2658 = dma.done.wait (%p3350_p7), %s485_s5, 512  }
  0xae   : > { %2660 = vsyncadd (%p3350_p7), %s485_s5, 4294966784  ;;  %s493_s21 = sand.u32 1, %s2801_s25   ;;  %s3037_s19 = scalar_lea.vmem [#allocation5], %s3027_s13 }
  0xaf   : > { %s494_s29 = scalar_lea.sflag [#allocation6], %s493_s21 }
  0xb0   : > { %2662 = dma.done.wait (%p3350_p7), %s494_s29, 576  }
  0xb1   : > { %2664 = vsyncadd (%p3350_p7), %s494_s29, 4294966720  ;;  %s2074_s16 = sshll.u32 %s3024_s3, 2  ;;  %p3351_p9 = scmp.eq.s32.totalorder %s2801_s25, 0 }
  0xb2   : > { %s3044_s14 = scalar_lea.vmem [#allocation7], %s2074_s16 }
  0xb3   : > { %2666 = dma.done.wait (%p3351_p9), [#allocation9], 768   ;;  %p3352_p2 = pmov %p3351_p9 }
  0xb5   : > { %2668 = vsyncadd (%p3352_p2), [#allocation9], 4294966528  ;;  %p3353_p0 = pmov %p3352_p2 }
  0xb7   : > { %2670 = dma.done.wait (%p3353_p0), [#allocation12], 768   ;;  %p3354_p1 = pmov %p3353_p0 }
  0xb8   : > { %vm600_vm0 = vcmask 130048   ;;  %v592_v0 = vld [vmem:[#allocation8 + $0x8] sm:$0xff]  ;;  %v591_v1 = vld [vmem:[#allocation8] sm:$0xff]  ;;  %v583_v2 = vld [vmem:[%s488_s12] sm:$0xff]  ;;  %vm713_vm1 = vcmask 261120   ;;  %v2708_v46 = vmov 0.0  }
  0xb9   : > { %2672 = vsyncadd (%p3354_p1), [#allocation12], 4294966528  ;;  %2170 = vmatprep.subr.mxu0 %v592_v0  ;;  %2174 = vmatprep.mubr.msk.f32.mxu0 %vm600_vm0, %v583_v2  ;;  %v584_v3 = vld [vmem:[%s488_s12 + $0x8] sm:$0xff]  ;;  %v812_v4 = vld [vmem:[#allocation11 + $0x8] sm:$0xff]  ;;  %vm2709_vm2 = vmmov 0   ;;  %vm1457_vm8 = vcmask 64512  }
  0xba   : > { %2171 = vmatpush3.msra.mxu0 %v592_v0  ;;  %v585_v5 = vld [vmem:[%s488_s12 + $0x10] sm:$0xff]  ;;  %v811_v6 = vld [vmem:[#allocation11] sm:$0xff]  ;;  %v587_v8 = vld [vmem:[%s3037_s19] sm:$0xff]  ;;  %s570_s1 = scalar_lea.vmem [#allocation14], %s3027_s13  ;;  %s2124_s20 = sshll.u32 %s2801_s25, 9 }
  0xbb   : > { %2172 = vmatprep.subr.mxu0 %v591_v1  ;;  %v586_v7 = vld [vmem:[%s488_s12 + $0x18] sm:$0xff]  ;;  %v588_v9 = vld [vmem:[%s3037_s19 + $0x8] sm:$0xff]  ;;  %v589_v10 = vld [vmem:[%s3037_s19 + $0x10] sm:$0xff]  ;;  %s1853_s11 = sshll.u32 %s570_s1, 4  ;;  %s3355_s21 = sld [smem:[#allocation32_spill]]  ;;  %s3203_s11 = int_to_ptr.vmem [resolvable:$true] %s1853_s11 }
  0xbc   : > { %2173 = vmatpush3.msra.mxu0 %v591_v1  ;;  %v590_v11 = vld [vmem:[%s3037_s19 + $0x18] sm:$0xff]  ;;  %v705_v12 = vld [vmem:[#allocation10 + $0x18] sm:$0xff]  ;;  %v704_v13 = vld [vmem:[#allocation10 + $0x10] sm:$0xff]  ;;  %s1835_s16 = scalar_lea.sflag [#allocation4], %s3024_s3  ;;  %p3357_p5 = scmp.ne.s32.totalorder %s3336_s30, 0 }
  0xbd   : > { %2175 = vmatmul.mubr.msk.f32.vlgmr.msra.gmra.mxu0 %vm600_vm0, %v584_v3  ;;  %2194 = vmatprep.subr.mxu0 %v812_v4  ;;  %v703_v14 = vld [vmem:[#allocation10 + $0x8] sm:$0xff]  ;;  %v702_v15 = vld [vmem:[#allocation10] sm:$0xff]  ;;  %v922_v32 = vld [vmem:[#allocation13 + $0x8] sm:$0xff]  ;;  %s2711_s27 = smov [#allocation14]  }
  0xbe   : > { %2177 = vmatprep.mubr.msk.f32.mxu0 %vm600_vm0, %v585_v5  ;;  %2195 = vmatpush3.msra.mxu0 %v812_v4  ;;  %v924_v16 = vld [vmem:[#allocation13 + $0x18] sm:$0xff]  ;;  %v923_v29 = vld [vmem:[#allocation13 + $0x10] sm:$0xff]  ;;  %v921_v37 = vld [vmem:[#allocation13] sm:$0xff]  ;;  %s2593_s18 = sshll.u32 %s2711_s27, 4  ;;  %s2594_s18 = int_to_ptr.vmem [resolvable:$false] %s2593_s18 }
  0xbf   : > { %2196 = vmatprep.subr.mxu0 %v811_v6  ;;  %2180 = vmatprep.subr.mxu1 %v705_v12  ;;  %v2081_v17 = vld [vmem:[%s3291_s4] ss:$0 sm:$0xff]  ;;  %s2595_s23 = scalar_lea.vmem %s2594_s18, 1024  ;;  %p2596_p11 = scmp.lt.s32.totalorder %s3203_s11, %s2594_s18 }
  0xc0   : > { %2197 = vmatpush3.msra.mxu0 %v811_v6  ;;  %2181 = vmatpush3.msra.mxu1 %v705_v12  ;;  %v2091_v28 = vld [vmem:[%s3295_s8] ss:$0 sm:$0xff] }
  0xc1   : > { %2178 = vmatmul.mubr.msk.f32.gmra.mxu0 %vm600_vm0, %v586_v7  ;;  %2182 = vmatprep.subr.mxu1 %v704_v13  ;;  %v2086_v47 = vld [vmem:[%s3293_s6] ss:$0 sm:$0xff]  ;;  %s3356_s29 = smov %s3355_s21  ;;  %s3201_s19 = scalar_lea.hbm %s3355_s21, %s2124_s20 }
  0xc2   : > { %2198 = vmatprep.mubr.msk.f32.mxu0 %vm600_vm0, %v587_v8  ;;  %2183 = vmatpush3.msra.mxu1 %v704_v13  ;;  %v2096_v59 = vld [vmem:[%s3297_s10] ss:$0 sm:$0xff] }
  0xc3   : > { %2184 = vmatprep.subr.mxu1 %v703_v14  ;;  %2218 = vmatprep.subr.mxu0 %v2708_v46 }
  0xc4   : > { %2185 = vmatpush3.msra.mxu1 %v703_v14 }
  0xc5   : > { %2199 = vmatmul.mubr.msk.f32.vlgmr.msra.gmra.mxu0 %vm600_vm0, %v588_v9  ;;  %2186 = vmatprep.subr.mxu1 %v702_v15 }
  0xc6   : > { %2201 = vmatprep.mubr.msk.f32.mxu0 %vm600_vm0, %v589_v10  ;;  %2187 = vmatpush3.msra.mxu1 %v702_v15 }
  0xc7   : > { %2204 = vmatprep.subr.mxu1 %v924_v16 }
  0xc9   : > { %2202 = vmatmul.mubr.msk.f32.gmra.mxu0 %vm600_vm0, %v590_v11 }
  0xca   : > { %2220 = vmatprep.mubr.msk.f32.mxu0 %vm2709_vm2, %v2708_v46 }
 0x17d   : > { %v2176_v18 = vpop.f32.mrf.mxu0 }
 0x17e   : > { %v685_v19 = vadd.f32 %v2176_v18, %v2081_v17 }
 0x17f   : > { %v679_v20 = vpop.f32.mrf.mxu0 }
 0x180   : > { %v680_v21 = vadd.f32 %v2081_v17, %v679_v20  ;;  %v699_v24 = vmax.f32 %v685_v19, 0.0 }
 0x181   : > { %v2179_v22 = vpop.f32.mrf.mxu0 }
 0x182   : > { %v698_v23 = vmax.f32 %v680_v21, 0.0  ;;  %v695_v25 = vadd.f32 %v2179_v22, %v2081_v17 }
 0x183   : > { %v689_v26 = vpop.f32.mrf.mxu0 }
 0x184   : > { %v690_v27 = vadd.f32 %v2081_v17, %v689_v26  ;;  %2188 = vmatprep.mubr.msk.f32.mxu1 %vm713_vm1, %v698_v23  ;;  %v701_v33 = vmax.f32 %v695_v25, 0.0 }
 0x185   : > { %2189 = vmatmul.mubr.msk.f32.vlgmr.msra.gmra.mxu1 %vm713_vm1, %v699_v24  ;;  %v2200_v30 = vpop.f32.mrf.mxu0 }
 0x186   : > { %v700_v31 = vmax.f32 %v690_v27, 0.0  ;;  %2205 = vmatpush3.msra.mxu1 %v924_v16  ;;  %v904_v34 = vadd.f32 %v2200_v30, %v2091_v28 }
 0x187   : > { %v898_v35 = vpop.f32.mrf.mxu0  ;;  %2206 = vmatprep.subr.mxu1 %v923_v29 }
 0x188   : > { %v899_v36 = vadd.f32 %v2091_v28, %v898_v35  ;;  %2191 = vmatprep.mubr.msk.f32.mxu1 %vm713_vm1, %v700_v31  ;;  %2207 = vmatpush3.msra.mxu1 %v923_v29  ;;  %v918_v41 = vmax.f32 %v904_v34, 0.0 }
 0x189   : > { %2192 = vmatmul.mubr.msk.f32.gmra.mxu1 %vm713_vm1, %v701_v33  ;;  %v2203_v38 = vpop.f32.mrf.mxu0  ;;  %2208 = vmatprep.subr.mxu1 %v922_v32 }
 0x18a   : > { %v917_v39 = vmax.f32 %v899_v36, 0.0  ;;  %v914_v40 = vadd.f32 %v2203_v38, %v2091_v28  ;;  %2209 = vmatpush3.msra.mxu1 %v922_v32 }
 0x18b   : > { %v908_v42 = vpop.f32.mrf.mxu0  ;;  %2210 = vmatprep.subr.mxu1 %v921_v37 }
 0x18c   : > { %v909_v43 = vadd.f32 %v2091_v28, %v908_v42  ;;  %2211 = vmatpush3.msra.mxu1 %v921_v37  ;;  %2212 = vmatprep.mubr.msk.f32.mxu1 %vm713_vm1, %v917_v39  ;;  %v920_v44 = vmax.f32 %v914_v40, 0.0 }
 0x18d   : > { %2213 = vmatmul.mubr.msk.f32.vlgmr.msra.gmra.mxu1 %vm713_vm1, %v918_v41  ;;  %2228 = vmatprep.subr.mxu1 %v2708_v46 }
 0x18e   : > { %v919_v45 = vmax.f32 %v909_v43, 0.0 }
 0x190   : > { %2215 = vmatprep.mubr.msk.f32.mxu1 %vm713_vm1, %v919_v45 }
 0x191   : > { %2216 = vmatmul.mubr.msk.f32.gmra.mxu1 %vm713_vm1, %v920_v44 }
 0x192   : > { %2230 = vmatprep.mubr.msk.f32.mxu1 %vm2709_vm2, %v2708_v46 }
 0x245   : > { %v2190_v48 = vpop.f32.mrf.mxu1 }
 0x246   : > { %v3089_v49 = vadd.f32 %v2190_v48, %v2086_v47 }
 0x247   : > { %v792_v50 = vpop.f32.mrf.mxu1 }
 0x248   : > { %v1030_v51 = vmul.f32 %v3089_v49, %v3089_v49  ;;  %v3093_v52 = vadd.f32 %v2086_v47, %v792_v50 }
 0x249   : > { %v2193_v53 = vpop.f32.mrf.mxu1 }
 0x24a   : > { %v1040_v54 = vsel %vm713_vm1, %v1030_v51, 0.0  ;;  %v1029_v55 = vmul.f32 %v3093_v52, %v3093_v52  ;;  %v3098_v56 = vadd.f32 %v2193_v53, %v2086_v47 }
 0x24b   : > { %v1041_v57 = vrot.slane %v1040_v54, 4  ;;  %v802_v58 = vpop.f32.mrf.mxu1 }
 0x24c   : > { %v1033_v60 = vsel %vm713_vm1, %v1029_v55, 0.0  ;;  %v1032_v61 = vmul.f32 %v3098_v56, %v3098_v56  ;;  %v3106_v62 = vadd.f32 %v2086_v47, %v802_v58 }
 0x24d   : > { %v1034_v63 = vrot.slane %v1033_v60, 4  ;;  %v2214_v0 = vpop.f32.mrf.mxu1  ;;  %v1042_v4 = vadd.f32 %v1041_v57, %v1040_v54 }
 0x24e   : > { %v1054_v1 = vsel %vm713_vm1, %v1032_v61, 0.0  ;;  %v1031_v2 = vmul.f32 %v3106_v62, %v3106_v62  ;;  %v3111_v3 = vadd.f32 %v2214_v0, %v2096_v59 }
 0x24f   : > { %v1035_v5 = vadd.f32 %v1034_v63, %v1033_v60  ;;  %v1010_v6 = vpop.f32.mrf.mxu1  ;;  %v1055_v11 = vrot.slane %v1054_v1, 4  ;;  %v1043_v17 = vrot.slane %v1042_v4, 2 }
 0x250   : > { %v1047_v7 = vsel %vm713_vm1, %v1031_v2, 0.0  ;;  %v1074_v8 = vmul.f32 %v3111_v3, %v3111_v3  ;;  %v3116_v9 = vadd.f32 %v2096_v59, %v1010_v6 }
 0x251   : > { %v1036_v10 = vrot.slane %v1035_v5, 2  ;;  %v1048_v12 = vrot.slane %v1047_v7, 4  ;;  %v2217_v13 = vpop.f32.mrf.mxu1  ;;  %v1056_v25 = vadd.f32 %v1055_v11, %v1054_v1  ;;  %v1044_v31 = vadd.f32 %v1043_v17, %v1042_v4 }
 0x252   : > { %v1084_v14 = vsel %vm713_vm1, %v1074_v8, 0.0  ;;  %v1073_v15 = vmul.f32 %v3116_v9, %v3116_v9  ;;  %v3121_v16 = vadd.f32 %v2217_v13, %v2096_v59 }
 0x253   : > { %v1049_v18 = vadd.f32 %v1048_v12, %v1047_v7  ;;  %v1020_v19 = vpop.f32.mrf.mxu1  ;;  %v1085_v20 = vrot.slane %v1084_v14, 4  ;;  %v1037_v24 = vadd.f32 %v1036_v10, %v1035_v5  ;;  %v1057_v37 = vrot.slane %v1056_v25, 2 }
 0x254   : > { %v1077_v21 = vsel %vm713_vm1, %v1073_v15, 0.0  ;;  %v1076_v22 = vmul.f32 %v3121_v16, %v3121_v16  ;;  %v3126_v23 = vadd.f32 %v2096_v59, %v1020_v19  ;;  %v1045_v43 = vrot.slane %v1044_v31, 1 }
 0x255   : > { %v1050_v26 = vrot.slane %v1049_v18, 2  ;;  %v1086_v27 = vadd.f32 %v1085_v20, %v1084_v14  ;;  %v1078_v28 = vrot.slane %v1077_v21, 4  ;;  %v1038_v36 = vrot.slane %v1037_v24, 1 }
 0x256   : > { %v1098_v29 = vsel %vm713_vm1, %v1076_v22, 0.0  ;;  %v1075_v30 = vmul.f32 %v3126_v23, %v3126_v23  ;;  %v1058_v51 = vadd.f32 %v1057_v37, %v1056_v25  ;;  %v1046_v59 = vadd.f32 %v1045_v43, %v1044_v31 }
 0x257   : > { %v1087_v32 = vrot.slane %v1086_v27, 2  ;;  %v1079_v33 = vadd.f32 %v1078_v28, %v1077_v21  ;;  %v1099_v34 = vrot.slane %v1098_v29, 4  ;;  %v1051_v38 = vadd.f32 %v1050_v26, %v1049_v18 }
 0x258   : > { %v1091_v35 = vsel %vm713_vm1, %v1075_v30, 0.0  ;;  %v1039_v50 = vadd.f32 %v1038_v36, %v1037_v24  ;;  %v1059_v1 = vrot.slane %v1058_v51, 1  ;;  %v1062_v8 = vmax.f32 %v1046_v59, 1e-24  ;;  %v1423_v30 = vld [vmem:[%s3044_s14 + $0x2] sm:$0x1] }
 0x259   : > { %v1088_v39 = vadd.f32 %v1087_v32, %v1086_v27  ;;  %v1080_v40 = vrot.slane %v1079_v33, 2  ;;  %v1100_v41 = vadd.f32 %v1099_v34, %v1098_v29  ;;  %v1092_v42 = vrot.slane %v1091_v35, 4  ;;  %v1422_v29 = vld [vmem:[%s3044_s14 + $0x1] sm:$0x1]  ;;  %v1424_v34 = vld [vmem:[%s3044_s14 + $0x3] sm:$0x1] }
 0x25a   : > { %v1052_v53 = vrot.slane %v1051_v38, 1  ;;  %v1061_v0 = vmax.f32 %v1039_v50, 1e-24  ;;  %v1060_v11 = vadd.f32 %v1059_v1, %v1058_v51  ;;  %v2710_v32 = vmov 0  }
 0x25b   : > { %v1089_v44 = vrot.slane %v1088_v39, 1  ;;  %v1081_v45 = vadd.f32 %v1080_v40, %v1079_v33  ;;  %v1101_v47 = vrot.slane %v1100_v41, 2  ;;  %v1093_v48 = vadd.f32 %v1092_v42, %v1091_v35 }
 0x25c   : > { %v1053_v2 = vadd.f32 %v1052_v53, %v1051_v38  ;;  %v1064_v15 = vmax.f32 %v1060_v11, 1e-24  ;;  %vm1426_vm4 = vcmp.eq.s32.totalorder %v1422_v29, 1  ;;  %vm1427_vm5 = vcmp.eq.s32.totalorder %v1423_v30, 1 }
 0x25d   : > { %v1090_v54 = vadd.f32 %v1089_v44, %v1088_v39  ;;  %v1082_v55 = vrot.slane %v1081_v45, 1  ;;  %v1102_v57 = vadd.f32 %v1101_v47, %v1100_v41  ;;  %v1094_v58 = vrot.slane %v1093_v48, 2 }
 0x25e   : > { %v1063_v12 = vmax.f32 %v1053_v2, 1e-24  ;;  %v1430_v36 = vsel %vm1426_vm4, 1, %v2710_v32  ;;  %v1431_v37 = vsel %vm1427_vm5, 1, %v2710_v32  ;;  %vm1428_vm6 = vcmp.eq.s32.totalorder %v1424_v34, 1 }
 0x25f   : > { %v1083_v60 = vadd.f32 %v1082_v55, %v1081_v45  ;;  %v1103_v61 = vrot.slane %v1102_v57, 1  ;;  %v1095_v63 = vadd.f32 %v1094_v58, %v1093_v48  ;;  %v1106_v4 = vmax.f32 %v1090_v54, 1e-24 }
 0x260   : > { %v1432_v40 = vsel %vm1428_vm6, 1, %v2710_v32 }
 0x261   : > { %v1105_v5 = vmax.f32 %v1083_v60, 1e-24  ;;  %v1104_v6 = vadd.f32 %v1103_v61, %v1102_v57  ;;  %v1096_v7 = vrot.slane %v1095_v63, 1 }
 0x263   : > { %2369 = vrsqrt.f32 %v1105_v5  ;;  %v1097_v10 = vadd.f32 %v1096_v7, %v1095_v63  ;;  %v1108_v13 = vmax.f32 %v1104_v6, 1e-24 }
 0x264   : > { %2371 = vrsqrt.f32 %v1061_v0 }
 0x265   : > { %2373 = vrsqrt.f32 %v1106_v4  ;;  %v1107_v14 = vmax.f32 %v1097_v10, 1e-24 }
 0x266   : > { %2375 = vrsqrt.f32 %v1062_v8 }
 0x267   : > { %2377 = vrsqrt.f32 %v1107_v14 }
 0x268   : > { %2379 = vrsqrt.f32 %v1063_v12 }
 0x269   : > { %2381 = vrsqrt.f32 %v1108_v13 }
 0x26a   : > { %2383 = vrsqrt.f32 %v1064_v15 }
 0x270   : > { %v2370_v17 = vpop.eup %2369 }
 0x271   : > { %v2372_v18 = vpop.eup %2371  ;;  %v1113_v19 = vmul.f32 %v2370_v17, %v3116_v9 }
 0x272   : > { %v2374_v20 = vpop.eup %2373  ;;  %v1069_v24 = vmul.f32 %v2372_v18, %v3093_v52 }
 0x273   : > { %v2376_v21 = vpop.eup %2375  ;;  %2219 = vmatpush3.xpose.msk.msra.mxu0 %vm713_vm1, %v1113_v19  ;;  %v1114_v26 = vmul.f32 %v2374_v20, %v3111_v3 }
 0x274   : > { %v2378_v22 = vpop.eup %2377  ;;  %2223 = vmatprep.subr.mxu0 %v2708_v46  ;;  %v1070_v9 = vmul.f32 %v2376_v21, %v3089_v49 }
 0x275   : > { %v2380_v25 = vpop.eup %2379  ;;  %v3138_v27 = vmul.f32 %v2378_v22, %v3126_v23 }
 0x276   : > { %v2382_v28 = vpop.eup %2381  ;;  %2221 = vmatmul.mubr.msk.f32.vlgmr.msra.gmra.mxu0 %vm713_vm1, %v1069_v24  ;;  %v1071_v52 = vmul.f32 %v2380_v25, %v3106_v62  ;;  %v1421_v62 = vld [vmem:[%s3044_s14] sm:$0x1]  ;;  %s2589_s14 = scalar_lea.vmem %s3203_s11, 512 }
 0x277   : > { %2224 = vmatpush3.xpose.msk.msra.mxu0 %vm713_vm1, %v1114_v26  ;;  %2229 = vmatpush3.xpose.msk.msra.mxu1 %vm713_vm1, %v3138_v27  ;;  %v2384_v3 = vpop.eup %2383  ;;  %v3150_v23 = vmul.f32 %v2382_v28, %v3121_v16  ;;  %vm1425_vm3 = vcmp.eq.s32.totalorder %v1421_v62, 1  ;;  %p2590_p12 = scmp.ne.s32.totalorder %s3203_s11, %s2589_s14  ;;  %p2597_p6 = scmp.lt.s32.totalorder %s2595_s23, %s2589_s14 }
 0x278   : > { %2225 = vmatprep.mubr.msk.f32.mxu0 %vm2709_vm2, %v2708_v46  ;;  %2233 = vmatprep.subr.mxu0 %v2708_v46  ;;  %v1072_v49 = vmul.f32 %v2384_v3, %v3098_v56  ;;  %v1433_v56 = vlaneseq  ;;  %v1429_v33 = vsel %vm1425_vm3, 1, %v2710_v32 }
 0x279   : > { %2238 = vmatprep.subr.mxu1 %v2708_v46  ;;  %p2591_p4 = pnand %p2590_p12, %p3357_p5  ;;  %p2598_p10 = por %p2597_p6, %p2596_p11 }
 0x27a   : > { %2226 = vmatmul.mubr.msk.f32.vlgmr.msra.gmra.mxu0 %vm713_vm1, %v1070_v9  ;;  %2231 = vmatmul.mubr.msk.f32.vlgmr.msra.gmra.mxu1 %vm713_vm1, %v1071_v52  ;;  %v1434_v16 = vshrl.u32 %v1433_v56, 7 }
 0x27b   : > { %2234 = vmatpush3.xpose.msk.msra.mxu0 %vm713_vm1, %v3150_v23  ;;  %2239 = vmatpush3.msra.mxu1 %v1113_v19  ;;  %p2592_p8 = pneg %p2591_p4 }
 0x27c   : > { %2235 = vmatprep.mubr.msk.f32.mxu0 %vm2709_vm2, %v2708_v46  ;;  %2243 = vmatprep.subr.mxu0 %v2708_v46  ;;  %v1435_v31 = vsub.s32 0, %v1434_v16 }
 0x27d   : > { %2240 = vmatprep.mubr.msk.f32.mxu1 %vm2709_vm2, %v2708_v46  ;;  %2248 = vmatprep.subr.mxu1 %v2708_v46  ;;  %p2599_p3 = pnand %p2598_p10, %p2592_p8 }
 0x27e   : > { %2236 = vmatmul.mubr.msk.f32.vlgmr.msra.gmra.mxu0 %vm713_vm1, %v1072_v49  ;;  %v1436_v35 = vrot.slane %v1429_v33, %v1435_v31  ;;  %v1440_v38 = vrot.slane %v1430_v36, %v1435_v31  ;;  %v1444_v39 = vrot.slane %v1431_v37, %v1435_v31  ;;  %v1448_v45 = vrot.slane %v1432_v40, %v1435_v31 }
 0x27f   : > { %2244 = vmatpush3.msra.mxu0 %v1114_v26  ;;  %2245 = vmatprep.mubr.msk.f32.mxu0 %vm2709_vm2, %v2708_v46 }
 0x280   : > { %2253 = vmatprep.subr.mxu0 %v2708_v46  ;;  %vm1449_vm7 = vcmp.eq.s32.totalorder %v1436_v35, 1  ;;  %vm1450_vm9 = vcmp.eq.s32.totalorder %v1440_v38, 1  ;;  %vm1451_vm10 = vcmp.eq.s32.totalorder %v1444_v39, 1  ;;  %vm1452_vm11 = vcmp.eq.s32.totalorder %v1448_v45, 1 }
 0x336   : > { %v1189_v41 = vpop.f32.mrf.mxu0 }
 0x337   : > { %v1453_v42 = vsel %vm1449_vm7, -1e+32, %v1189_v41 }
 0x338   : > { %v1458_v43 = vsel %vm1457_vm8, %v1453_v42, -inf  ;;  %v2222_v44 = vpop.f32.mrf.mxu0 }
 0x339   : > { %v1459_v47 = vrot.slane %v1458_v43, 4 }
 0x33a   : > { %v1265_v48 = vpop.f32.mrf.mxu0  ;;  %v1341_v50 = vpop.f32.mrf.mxu1 }
 0x33b   : > { %v1460_v51 = vmax.f32 %v1458_v43, %v1459_v47  ;;  %v1454_v53 = vsel %vm1450_vm9, -1e+32, %v1265_v48  ;;  %v1455_v54 = vsel %vm1451_vm10, -1e+32, %v1341_v50 }
 0x33c   : > { %v1465_v55 = vsel %vm1457_vm8, %v1454_v53, -inf  ;;  %v1472_v57 = vsel %vm1457_vm8, %v1455_v54, -inf  ;;  %v2227_v58 = vpop.f32.mrf.mxu0  ;;  %v2232_v59 = vpop.f32.mrf.mxu1 }
 0x33d   : > { %v1461_v60 = vrot.slane %v1460_v51, 2  ;;  %v1466_v61 = vrot.slane %v1465_v55, 4  ;;  %v1473_v63 = vrot.slane %v1472_v57, 4 }
 0x33e   : > { %v1417_v0 = vpop.f32.mrf.mxu0 }
 0x33f   : > { %v1462_v1 = vmax.f32 %v1460_v51, %v1461_v60  ;;  %v1467_v2 = vmax.f32 %v1465_v55, %v1466_v61  ;;  %v1474_v4 = vmax.f32 %v1472_v57, %v1473_v63  ;;  %v1456_v5 = vsel %vm1452_vm11, -1e+32, %v1417_v0 }
 0x340   : > { %v1479_v6 = vsel %vm1457_vm8, %v1456_v5, -inf  ;;  %v2237_v7 = vpop.f32.mrf.mxu0 }
 0x341   : > { %v1463_v8 = vrot.slane %v1462_v1, 1  ;;  %v1468_v10 = vrot.slane %v1467_v2, 2  ;;  %v1475_v11 = vrot.slane %v1474_v4, 2  ;;  %v1480_v12 = vrot.slane %v1479_v6, 4 }
 0x343   : > { %v1464_v13 = vmax.f32 %v1462_v1, %v1463_v8  ;;  %v1469_v14 = vmax.f32 %v1467_v2, %v1468_v10  ;;  %v1476_v15 = vmax.f32 %v1474_v4, %v1475_v11  ;;  %v1481_v17 = vmax.f32 %v1479_v6, %v1480_v12 }
 0x345   : > { %v1486_v18 = vsub.f32 %v1453_v42, %v1464_v13  ;;  %v1470_v19 = vrot.slane %v1469_v14, 1  ;;  %v1477_v20 = vrot.slane %v1476_v15, 1  ;;  %v1482_v21 = vrot.slane %v1481_v17, 2 }
 0x347   : > { %v1490_v22 = vmul.f32 1.442695, %v1486_v18  ;;  %v1471_v24 = vmax.f32 %v1469_v14, %v1470_v19  ;;  %v1478_v25 = vmax.f32 %v1476_v15, %v1477_v20  ;;  %v1483_v26 = vmax.f32 %v1481_v17, %v1482_v21 }
 0x349   : > { %2385 = vpow2.f32 %v1490_v22  ;;  %v1487_v28 = vsub.f32 %v1454_v53, %v1471_v24  ;;  %v1488_v9 = vsub.f32 %v1455_v54, %v1478_v25  ;;  %v1484_v52 = vrot.slane %v1483_v26, 1 }
 0x34b   : > { %v1492_v3 = vmul.f32 1.442695, %v1487_v28  ;;  %v1494_v49 = vmul.f32 1.442695, %v1488_v9  ;;  %v1485_v56 = vmax.f32 %v1483_v26, %v1484_v52 }
 0x34d   : > { %2387 = vpow2.f32 %v1492_v3  ;;  %v1489_v62 = vsub.f32 %v1456_v5, %v1485_v56 }
 0x34e   : > { %2389 = vpow2.f32 %v1494_v49 }
 0x34f   : > { %v1496_v16 = vmul.f32 1.442695, %v1489_v62 }
 0x351   : > { %2391 = vpow2.f32 %v1496_v16 }
 0x356   : > { %v2386_v29 = vpop.eup %2385 }
 0x357   : > { %v1498_v30 = vsel %vm1457_vm8, %v2386_v29, 0.0 }
 0x358   : > { %v1499_v31 = vrot.slane %v1498_v30, 4 }
 0x35a   : > { %v2388_v32 = vpop.eup %2387  ;;  %v1500_v33 = vadd.f32 %v1499_v31, %v1498_v30 }
 0x35b   : > { %v2390_v34 = vpop.eup %2389  ;;  %v1505_v35 = vsel %vm1457_vm8, %v2388_v32, 0.0 }
 0x35c   : > { %v1501_v36 = vrot.slane %v1500_v33, 2  ;;  %v1506_v37 = vrot.slane %v1505_v35, 4  ;;  %v1512_v38 = vsel %vm1457_vm8, %v2390_v34, 0.0 }
 0x35d   : > { %v1513_v39 = vrot.slane %v1512_v38, 4 }
 0x35e   : > { %v2392_v40 = vpop.eup %2391  ;;  %v1502_v41 = vadd.f32 %v1501_v36, %v1500_v33  ;;  %v1507_v42 = vadd.f32 %v1506_v37, %v1505_v35 }
 0x35f   : > { %v1514_v43 = vadd.f32 %v1513_v39, %v1512_v38  ;;  %v1519_v44 = vsel %vm1457_vm8, %v2392_v40, 0.0 }
 0x360   : > { %v1503_v45 = vrot.slane %v1502_v41, 1  ;;  %v1508_v47 = vrot.slane %v1507_v42, 2  ;;  %v1520_v48 = vrot.slane %v1519_v44, 4 }
 0x361   : > { %v1515_v50 = vrot.slane %v1514_v43, 2 }
 0x362   : > { %v1504_v51 = vadd.f32 %v1503_v45, %v1502_v41  ;;  %v1509_v53 = vadd.f32 %v1508_v47, %v1507_v42  ;;  %v1521_v54 = vadd.f32 %v1520_v48, %v1519_v44 }
 0x363   : > { %v1516_v55 = vadd.f32 %v1515_v50, %v1514_v43 }
 0x364   : > { %2393 = vrcp.f32 %v1504_v51  ;;  %v1510_v57 = vrot.slane %v1509_v53, 1  ;;  %v1522_v58 = vrot.slane %v1521_v54, 2 }
 0x365   : > { %v1517_v59 = vrot.slane %v1516_v55, 1 }
 0x366   : > { %v1511_v60 = vadd.f32 %v1510_v57, %v1509_v53  ;;  %v1523_v61 = vadd.f32 %v1522_v58, %v1521_v54 }
 0x367   : > { %v1518_v63 = vadd.f32 %v1517_v59, %v1516_v55 }
 0x368   : > { %2395 = vrcp.f32 %v1511_v60  ;;  %v1524_v0 = vrot.slane %v1523_v61, 1 }
 0x369   : > { %2397 = vrcp.f32 %v1518_v63 }
 0x36a   : > { %v1525_v1 = vadd.f32 %v1524_v0, %v1523_v61 }
 0x36c   : > { %2399 = vrcp.f32 %v1525_v1 }
 0x371   : > { %v2394_v2 = vpop.eup %2393 }
 0x372   : > { %v1527_v4 = vmul.f32 %v2394_v2, %v2386_v29 }
 0x374   : > { %1534 = vst.msk [vmem:[%s570_s1] sm:$0xff] %vm1457_vm8, %v1527_v4  ;;  %2241 = vmatmul.mubr.msk.f32.vlgmr.msra.gmra.mxu1 %vm1457_vm8, %v1527_v4 }
 0x375   : > { %v2396_v5 = vpop.eup %2395  ;;  %2249 = vmatpush3.msra.mxu1 %v3138_v27  ;;  %2250 = vmatprep.mubr.msk.f32.mxu1 %vm2709_vm2, %v2708_v46 }
 0x376   : > { %v2398_v6 = vpop.eup %2397  ;;  %v1529_v7 = vmul.f32 %v2396_v5, %v2388_v32 }
 0x377   : > { %v1531_v8 = vmul.f32 %v2398_v6, %v2390_v34 }
 0x378   : > { %1535 = vst.msk [vmem:[%s570_s1 + $0x8] sm:$0xff] %vm1457_vm8, %v1529_v7  ;;  %2246 = vmatmul.mubr.msk.f32.vlgmr.msra.gmra.mxu0 %vm1457_vm8, %v1529_v7 }
 0x379   : > { %v2400_v10 = vpop.eup %2399  ;;  %1536 = vst.msk [vmem:[%s570_s1 + $0x10] sm:$0xff] %vm1457_vm8, %v1531_v8  ;;  %2251 = vmatmul.mubr.msk.f32.vlgmr.msra.gmra.mxu1 %vm1457_vm8, %v1531_v8  ;;  %2254 = vmatpush3.msra.mxu0 %v3150_v23 }
 0x37a   : > { %2255 = vmatprep.mubr.msk.f32.mxu0 %vm2709_vm2, %v2708_v46  ;;  %v1533_v27 = vmul.f32 %v2400_v10, %v2392_v40 }
 0x37c   : > { %1537 = vst.msk [vmem:[%s570_s1 + $0x18] sm:$0xff] %vm1457_vm8, %v1533_v27  ;;  %2256 = vmatmul.mubr.msk.f32.vlgmr.msra.gmra.mxu0 %vm1457_vm8, %v1533_v27 }
 0x37d   : > { %2602 = shalt.err (!%p2599_p3)
}
 0x37e   : > { %s2603_s26 = scalar_lea.hbm %s3201_s19, 512  ;;  %s2607_s28 = scalar_lea.hbm %s3356_s29, 1024 }
 0x37f   : > { %p2604_p13 = scmp.ne.s32.totalorder %s3201_s19, %s2603_s26  ;;  %p2608_p2 = scmp.lt.s32.totalorder %s3201_s19, %s3356_s29 }
 0x380   : > { %p2609_p0 = scmp.lt.s32.totalorder %s2607_s28, %s2603_s26 }
 0x381   : > { %p2605_p7 = pnand %p2604_p13, %p3357_p5 }
 0x382   : > { %p2610_p1 = por %p2609_p0, %p2608_p2 }
 0x383   : > { %p2606_p9 = pneg %p2605_p7 }
 0x385   : > { %p2611_p12 = pnand %p2610_p1, %p2606_p9 }
 0x387   : > { %2614 = shalt.err (!%p2611_p12)
}
 0x388   : > { %s2712_s5 = smov 128   ;;  %s2713_s12 = smov 8  }
 0x389   : > { %2280 = dma.vmem_to_hbm [thread:$0]  (%p3357_p5), %s3203_s11, 512, %s3201_s19, %s1835_s16, %s2712_s5, %s2712_s5, %s2713_s12  }
 0x38a   : > { %s577_s21 = scalar_lea.vmem [#allocation15], %s3027_s13  ;;  %s3358_s19 = sld [smem:[#allocation33_spill]] }
 0x38b   : > { %s1869_s14 = sshll.u32 %s577_s21, 4  ;;  %s1840_s27 = scalar_lea.sflag [#allocation16], %s3024_s3  ;;  %s3234_s14 = int_to_ptr.vmem [resolvable:$true] %s1869_s14 }
 0x38c   : > { %s2615_s18 = scalar_lea.vmem %s3234_s14, 512  ;;  %s2714_s23 = smov [#allocation15]  }
 0x38d   : > { %p2616_p4 = scmp.ne.s32.totalorder %s3234_s14, %s2615_s18  ;;  %s2619_s26 = sshll.u32 %s2714_s23, 4  ;;  %s2620_s26 = int_to_ptr.vmem [resolvable:$false] %s2619_s26 }
 0x38e   : > { %s2621_s7 = scalar_lea.vmem %s2620_s26, 1024  ;;  %p2622_p6 = scmp.lt.s32.totalorder %s3234_s14, %s2620_s26 }
 0x38f   : > { %p2617_p8 = pnand %p2616_p4, %p3357_p5  ;;  %p2623_p10 = scmp.lt.s32.totalorder %s2621_s7, %s2615_s18 }
 0x390   : > { %s3242_s16 = scalar_lea.hbm %s3358_s19, %s2124_s20 }
 0x391   : > { %p2618_p11 = pneg %p2617_p8  ;;  %p2624_p3 = por %p2623_p10, %p2622_p6 }
 0x393   : > { %p2625_p13 = pnand %p2624_p3, %p2618_p11 }
 0x434   : > { %v1607_v46 = vpop.f32.mrf.mxu1 }
 0x435   : > { %1830 = vst.msk [vmem:[%s577_s21] sm:$0xff] %vm713_vm1, %v1607_v46 }
 0x436   : > { %v2242_v23 = vpop.f32.mrf.mxu1 }
 0x438   : > { %v1680_v11 = vpop.f32.mrf.mxu0 }
 0x439   : > { %1831 = vst.msk [vmem:[%s577_s21 + $0x8] sm:$0xff] %vm713_vm1, %v1680_v11  ;;  %v1753_v12 = vpop.f32.mrf.mxu1 }
 0x43a   : > { %1832 = vst.msk [vmem:[%s577_s21 + $0x10] sm:$0xff] %vm713_vm1, %v1753_v12  ;;  %v2247_v13 = vpop.f32.mrf.mxu0 }
 0x43b   : > { %v2252_v14 = vpop.f32.mrf.mxu1 }
 0x43c   : > { %v1826_v15 = vpop.f32.mrf.mxu0 }
 0x43d   : > { %1833 = vst.msk [vmem:[%s577_s21 + $0x18] sm:$0xff] %vm713_vm1, %v1826_v15 }
 0x43e   : > { %v2257_v17 = vpop.f32.mrf.mxu0 }
 0x43f   : > { %2628 = shalt.err (!%p2625_p13)
}
 0x440   : > { %s2629_s25 = scalar_lea.hbm %s3242_s16, 512  ;;  %s2633_s17 = scalar_lea.hbm %s3358_s19, 1024 }
 0x441   : > { %p2630_p7 = scmp.ne.s32.totalorder %s3242_s16, %s2629_s25  ;;  %p2634_p0 = scmp.lt.s32.totalorder %s3242_s16, %s3358_s19 }
 0x442   : > { %p2635_p1 = scmp.lt.s32.totalorder %s2633_s17, %s2629_s25 }
 0x443   : > { %p2631_p9 = pnand %p2630_p7, %p3357_p5 }
 0x444   : > { %p2636_p12 = por %p2635_p1, %p2634_p0 }
 0x445   : > { %p2632_p2 = pneg %p2631_p9 }
 0x447   : > { %p2637_p4 = pnand %p2636_p12, %p2632_p2 }
 0x449   : > { %2640 = shalt.err (!%p2637_p4)
}
 0x44a   : > { %2281 = dma.vmem_to_hbm [thread:$0]  (%p3357_p5), %s3234_s14, 512, %s3242_s16, %s1840_s27, %s2712_s5, %s2712_s5, %s2713_s12  }
 0x44b PF: > { %s3359_s1 = sld [smem:[#allocation23_spill]]  ;;  %p3362_p11 = scmp.ge.s32.totalorder %s2695_s24, 2 }
 0x44c   : > { %s3360_s21 = sld [smem:[#allocation25_spill]] }
 0x451   : > { %s1884_s13 = sand.u32 1, %s3359_s1  }
 0x452   : > { %p3361_p8 = scmp.ne.s32.totalorder %s3360_s21, 0  ;;  %s1885_s11 = scalar_lea.sflag [#allocation4], %s1884_s13 }
 0x454   : > { %p2308_p6 = pnand %p3362_p11, %p3361_p8 }
 0x456   : > { %p2309_p10 = pneg %p2308_p6 }
 0x458   : > { %2674 = dma.done.wait (%p2309_p10), %s1885_s11, 512  }
 0x459   : > { %2676 = vsyncadd (%p2309_p10), %s1885_s11, 4294966784  ;;  %s1894_s18 = scalar_lea.sflag [#allocation16], %s1884_s13 }
 0x45a   : > { %2678 = dma.done.wait (%p2309_p10), %s1894_s18, 512  }
 0x45b   : > { %2680 = vsyncadd (%p2309_p10), %s1894_s18, 4294966784  ;;  %s3363_s24 = sld [smem:[#allocation26_spill]]  ;;  %s3366_s21 = smov %s2687_s22 }
 0x45c   : > { %s3364_s30 = sld [smem:[#allocation24_spill]] }
 0x45d   : > { %s3365_s23 = sld [smem:[#allocation27_spill]] }
 0x461   : > { %p34_p5 = scmp.ge.s32.totalorder %s3363_s24, 4  }
 0x462   : > { %s3367_s22 = smov %s3364_s30 }
 0x463   :  { %36 = sbr.rel (!%p34_p5) target bundleno = 18 (0x12), region = 166 }
 0x468   :  { %1899 = vsyncpa [#allocation3], 1 }
 0x469   :  { %1901 = vsyncpa [#allocation3 + $0x1], 1 }
 0x46a   :  { %1902 = vsyncpa [#allocation6], 1 }
 0x46b   :  { %1904 = vsyncpa [#allocation6 + $0x1], 1 }
 0x46c   :  { %1905 = vsyncpa [#allocation9], 1 }
 0x46d   :  { %1906 = vsyncpa [#allocation12], 1 }
 0x46e   :  { %1907 = vsyncpa [#allocation4], 1 }
 0x46f   :  { %1909 = vsyncpa [#allocation4 + $0x1], 1 }
 0x470   :  { %1910 = vsyncpa [#allocation16], 1 }
 0x471   :  { %1912 = vsyncpa [#allocation16 + $0x1], 1 }

// kernel: tpu_custom_call.1
= control target key start
LH: loop header
LB: loop body
LE: loop exit
PB: predicated region body
PF: predicated region fallthrough
CT: control target
= control target key end

     0   :  { %s3287_s0 = inlined_call_operand.hbm [shape: f32[8,8,16], index: 0, kind: input, shape index: {}]   ;;  %s3288_s1 = inlined_call_operand.hbm [shape: f32[8,8,16], index: 1, kind: input, shape index: {}]   ;;  %s3289_s2 = inlined_call_operand.hbm [shape: s32[8,1,8], index: 2, kind: input, shape index: {}]   ;;  %s3290_s3 = inlined_call_operand.hbm [shape: f32[16,32], index: 3, kind: input, shape index: {}]   ;;  %s3291_s4 = inlined_call_operand.vmem [shape: f32[1,32], index: 4, kind: input, shape index: {}]   ;;  %s3292_s5 = inlined_call_operand.hbm [shape: f32[32,32], index: 5, kind: input, shape index: {}]   ;;  %s3293_s6 = inlined_call_operand.vmem [shape: f32[1,32], index: 6, kind: input, shape index: {}]   ;;  %s3294_s7 = inlined_call_operand.hbm [shape: f32[16,32], index: 7, kind: input, shape index: {}]   ;;  %s3295_s8 = inlined_call_operand.vmem [shape: f32[1,32], index: 8, kind: input, shape index: {}]   ;;  %s3296_s9 = inlined_call_operand.hbm [shape: f32[32,32], index: 9, kind: input, shape index: {}]   ;;  %s3297_s10 = inlined_call_operand.vmem [shape: f32[1,32], index: 10, kind: input, shape index: {}]   ;;  %s3298_s11 = inlined_call_operand.hbm [shape: f32[8,8,8], index: 11, kind: output, shape index: {0}]   ;;  %s3299_s12 = inlined_call_operand.hbm [shape: f32[8,8,32], index: 12, kind: output, shape index: {1}]  }
   0x1   :  { %3320 = sst [smem:[#allocation28_spill]] %s3288_s1 }
   0x2   :  { %3321 = sst [smem:[#allocation29_spill]] %s3290_s3 }
   0x3   :  { %3322 = sst [smem:[#allocation30_spill]] %s3292_s5 }
   0x4   :  { %3323 = sst [smem:[#allocation31_spill]] %s3294_s7 }
   0x5   :  { %3324 = sst [smem:[#allocation32_spill]] %s3298_s11 }
   0x6   :  { %3325 = sst [smem:[#allocation33_spill]] %s3299_s12 }
   0x7   :  { %18 = vsyncpa [#allocation3], 0 }
   0x8   :  { %20 = vsyncpa [#allocation3 + $0x1], 0 }
   0x9   :  { %21 = vsyncpa [#allocation6], 0 }
   0xa   :  { %23 = vsyncpa [#allocation6 + $0x1], 0 }
   0xb   :  { %24 = vsyncpa [#allocation9], 0 }
   0xc   :  { %25 = vsyncpa [#allocation12], 0 }
   0xd   :  { %26 = vsyncpa [#allocation4], 0 }
   0xe   :  { %28 = vsyncpa [#allocation4 + $0x1], 0 }
   0xf   :  { %29 = vsyncpa [#allocation16], 0 }
  0x10   :  { %31 = vsyncpa [#allocation16 + $0x1], 0  ;;  %s2780_s21 = smov 0   ;;  %s2782_s22 = smov 0  }
  0x11   :  { %s2784_s23 = smov 0   ;;  %s2786_s24 = smov 0  }
  0x12 LB: > { %3326 = sst [smem:[#allocation23_spill]] %s2683_s21  ;;  %s2801_s25 = sadd.s32 4294967295, %s2695_s24   ;;  %s2695_s24 = sphi %s2786_s24, %s3363_s24   ;;  %s2691_s23 = sphi %s2784_s23, %s3365_s23   ;;  %s2687_s22 = sphi %s2782_s22, %s3367_s22   ;;  %s2683_s21 = sphi %s2780_s21, %s3366_s21  }
  0x13   : > { %3327 = sst [smem:[#allocation24_spill]] %s2691_s23  ;;  %s2055_s26 = sadd.s32 4294967294, %s2695_s24  }
  0x14   : > { %p57_p0 = scmp.ne.s32.totalorder %s2687_s22, %s2683_s21  ;;  %p3312_p1 = scmp.eq.s32.totalorder %s2801_s25, 0 }
  0x15   : > { %p301_p2 = scmp.eq.s32.totalorder %s2801_s25, 1  ;;  %p307_p3 = scmp.eq.s32.totalorder %s2055_s26, 1 }
  0x16   : > { %p2810_p4 = por %p3312_p1, %p57_p0  ;;  %p2056_p5 = scmp.ge.s32.totalorder %s2695_s24, 1 }
  0x17   : > { %p2815_p6 = por %p307_p3, %p57_p0  ;;  %p340_p7 = scmp.lt.s32.totalorder %s2695_s24, 3 }
  0x18   : > { %s3328_s27 = scalar_select %p2810_p4, 1, 0 }
  0x19   : > { %s3329_s28 = scalar_select %p2815_p6, 1, 0 }
  0x1a   : > { %p2820_p8 = pnand %p2056_p5, %p340_p7  ;;  %s2697_s30 = smov [#allocation8]  }
  0x1b   : > { %3330 = sst [smem:[#allocation25_spill]] %s3329_s28  ;;  %s352_s13 = sshll.u32 %s2697_s30, 4  ;;  %s353_s13 = int_to_ptr.vmem [resolvable:$true] %s352_s13 }
  0x1c   : > { %s3331_s29 = scalar_select %p2820_p8, 1, 0 }
  0x1d   : > { %p2284_p9 = pneg %p2820_p8  ;;  %s2698_s15 = smov [#allocation11]  }
  0x1e   : > { %s384_s16 = sshll.u32 %s2698_s15, 4  ;;  %s2412_s17 = scalar_lea.vmem %s353_s13, 256  ;;  %s385_s16 = int_to_ptr.vmem [resolvable:$true] %s384_s16 }
  0x1f   : > { %p2829_p11 = pnand %p2284_p9, %p3312_p1  ;;  %p2413_p13 = scmp.ne.s32.totalorder %s353_s13, %s2412_s17 }
  0x20   : > { %p2420_p5 = scmp.lt.s32.totalorder %s353_s13, %s353_s13  ;;  %p2421_p7 = scmp.lt.s32.totalorder %s2412_s17, %s2412_s17 }
  0x21   : > { %s3332_s14 = scalar_select %p2829_p11, 1, 0 }
  0x22   : > { %p3313_p12 = pneg %p2829_p11  ;;  %p2422_p10 = por %p2421_p7, %p2420_p5 }
  0x24   : > { %p2415_p0 = pnand %p2413_p13, %p3313_p12 }
  0x26   : > { %p2416_p3 = pneg %p2415_p0 }
  0x28   : > { %p2423_p9 = pnand %p2422_p10, %p2416_p3 }
  0x2a   : > { %2426 = shalt.err (!%p2423_p9)
}
  0x2b   : > { %s3300_s18 = smov 128   ;;  %s3302_s19 = smov 8  }
  0x2c   : > { %s3333_s3 = sld [smem:[#allocation29_spill]]  ;;  %s2438_s30 = scalar_lea.vmem %s385_s16, 256 }
  0x2d   : > { %p2439_p13 = scmp.ne.s32.totalorder %s385_s16, %s2438_s30  ;;  %p2446_p10 = scmp.lt.s32.totalorder %s385_s16, %s385_s16 }
  0x2e   : > { %p2447_p3 = scmp.lt.s32.totalorder %s2438_s30, %s2438_s30 }
  0x2f   : > { %p2441_p0 = pnand %p2439_p13, %p3313_p12 }
  0x30   : > { %p2448_p7 = por %p2447_p3, %p2446_p10 }
  0x31   : > { %p2442_p5 = pneg %p2441_p0 }
  0x32   : > { %2287 = dma.hbm_to_vmem [thread:$0]  (!%p2829_p11), %s3333_s3, 256, %s353_s13, [#allocation9], %s3300_s18, %s3300_s18, %s3302_s19  }
  0x33   : > { %p2449_p9 = pnand %p2448_p7, %p2442_p5 }
  0x35   : > { %2452 = shalt.err (!%p2449_p9)
}
  0x36   : > { %s3334_s7 = sld [smem:[#allocation31_spill]]  ;;  %s2858_s13 = sadd.s32 1, %s2695_s24  }
  0x37   : > { %3335 = sst [smem:[#allocation26_spill]] %s2858_s13  ;;  %s44_s20 = sadd.s32 1, %s2691_s23 }
  0x38   : > { %s41_s26 = ssub.s32 %s2695_s24, %s2858_s13  ;;  %p51_p13 = scmp.ne.s32.totalorder %s2691_s23, %s2687_s22 }
  0x39   : > { %p42_p0 = scmp.eq.s32.totalorder %s41_s26, 0  ;;  %p52_p5 = scmp.eq.s32.totalorder %s2695_s24, 0 }
  0x3a   : > { %p2868_p10 = por %p301_p2, %p51_p13  ;;  %p2318_p3 = scmp.lt.s32.totalorder %s2695_s24, 2 }
  0x3b   : > { %s2874_s15 = scalar_select %p42_p0, %s2691_s23, %s44_s20  }
  0x3c   : > { %2293 = dma.hbm_to_vmem [thread:$0]  (!%p2829_p11), %s3334_s7, 256, %s385_s16, [#allocation12], %s3300_s18, %s3300_s18, %s3302_s19  }
  0x3d   : > { %s3336_s30 = scalar_select %p2868_p10, 1, 0 }
  0x3e   : > { %3337 = sst [smem:[#allocation27_spill]] %s2874_s15  ;;  %p53_p7 = por %p52_p5, %p51_p13 }
  0x3f   : > { %s2877_s17 = sand.u32 1, %s2691_s23   ;;  %s3311_s18 = sshll.u32 %s2695_s24, 9 }
  0x40   : > { %s3310_s16 = sshll.u32 %s2877_s17, 5  ;;  %p2881_p9 = pnand %p2318_p3, %p53_p7 }
  0x41   : > { %s438_s26 = sand.u32 1, %s2695_s24   ;;  %s3339_s1 = sld [smem:[#allocation28_spill]] }
  0x42   : > { %s442_s20 = scalar_lea.vmem [#allocation5], %s3310_s16  ;;  %s2701_s23 = smov [#allocation10]  }
  0x43   : > { %s449_s15 = sshll.u32 %s442_s20, 4  ;;  %s2897_s28 = sshll.u32 %s2701_s23, 4  ;;  %s2895_s15 = int_to_ptr.vmem [resolvable:$true] %s449_s15  ;;  %s369_s28 = int_to_ptr.vmem [resolvable:$true] %s2897_s28 }
  0x44   : > { %s2899_s21 = scalar_lea.sflag [#allocation6], %s438_s26  ;;  %p2905_p13 = pneg %p2881_p9 }
  0x47   : > { %s2891_s13 = scalar_lea.hbm %s3339_s1, %s3311_s18  ;;  %s2458_s16 = scalar_lea.hbm %s3339_s1, 1024 }
  0x48   : > { %s2453_s12 = scalar_lea.hbm %s2891_s13, 512  ;;  %p2459_p3 = scmp.lt.s32.totalorder %s2891_s13, %s3339_s1 }
  0x49   : > { %p2454_p2 = scmp.ne.s32.totalorder %s2891_s13, %s2453_s12  ;;  %p2460_p7 = scmp.lt.s32.totalorder %s2458_s16, %s2453_s12 }
  0x4b   : > { %p2456_p0 = pnand %p2905_p13, %p2454_p2  ;;  %p2461_p1 = por %p2460_p7, %p2459_p3 }
  0x4d   : > { %p2457_p5 = pneg %p2456_p0 }
  0x4f   : > { %p2462_p12 = pnand %p2461_p1, %p2457_p5 }
  0x51   : > { %2465 = shalt.err (!%p2462_p12)
}
  0x52   : > { %s2466_s26 = scalar_lea.vmem %s2895_s15, 512  ;;  %s2702_s11 = smov [#allocation5]  }
  0x53   : > { %p2467_p6 = scmp.ne.s32.totalorder %s2895_s15, %s2466_s26  ;;  %s2471_s7 = sshll.u32 %s2702_s11, 4  ;;  %s2472_s7 = int_to_ptr.vmem [resolvable:$false] %s2471_s7 }
  0x54   : > { %s2473_s20 = scalar_lea.vmem %s2472_s7, 1024  ;;  %p2474_p10 = scmp.lt.s32.totalorder %s2895_s15, %s2472_s7 }
  0x55   : > { %p2469_p2 = pnand %p2467_p6, %p2905_p13  ;;  %p2475_p4 = scmp.lt.s32.totalorder %s2473_s20, %s2466_s26 }
  0x57   : > { %p2470_p0 = pneg %p2469_p2  ;;  %p2476_p8 = por %p2475_p4, %p2474_p10 }
  0x59   : > { %p2477_p11 = pnand %p2476_p8, %p2470_p0 }
  0x5b   : > { %2480 = shalt.err (!%p2477_p11)
}
  0x5c   : > { %s3341_s12 = smov 8   ;;  %s3342_s18 = smov 128  }
  0x5d   : > { %2303 = dma.hbm_to_vmem [thread:$0]  (!%p2881_p9), %s2891_s13, 512, %s2895_s15, %s2899_s21, %s3342_s18, %s3342_s18, %s3341_s12  }
  0x5e   : > { %s2492_s11 = scalar_lea.vmem %s369_s28, 512  ;;  %p3343_p6 = scmp.ne.s32.totalorder %s3332_s14, 0 }
  0x5f   : > { %p2493_p1 = scmp.ne.s32.totalorder %s369_s28, %s2492_s11  ;;  %p2500_p8 = scmp.lt.s32.totalorder %s369_s28, %s369_s28 }
  0x60   : > { %p3344_p12 = pneg %p3343_p6  ;;  %p2501_p11 = scmp.lt.s32.totalorder %s2492_s11, %s2492_s11 }
  0x62   : > { %p2495_p5 = pnand %p2493_p1, %p3344_p12  ;;  %p2502_p10 = por %p2501_p11, %p2500_p8 }
  0x64   : > { %p2496_p4 = pneg %p2495_p5 }
  0x66   : > { %p2503_p3 = pnand %p2502_p10, %p2496_p4 }
  0x68   : > { %2506 = shalt.err (!%p2503_p3)
}
  0x69   : > { %s3345_s5 = sld [smem:[#allocation30_spill]]  ;;  %s2703_s13 = smov [#allocation13]  }
  0x6a   : > { %s400_s15 = sshll.u32 %s2703_s13, 4  ;;  %p3346_p2 = pmov %p3344_p12  ;;  %s401_s15 = int_to_ptr.vmem [resolvable:$true] %s400_s15 }
  0x6b   : > { %s2518_s26 = scalar_lea.vmem %s401_s15, 512  ;;  %p2526_p12 = scmp.lt.s32.totalorder %s401_s15, %s401_s15 }
  0x6c   : > { %p2519_p7 = scmp.ne.s32.totalorder %s401_s15, %s2518_s26  ;;  %p2527_p5 = scmp.lt.s32.totalorder %s2518_s26, %s2518_s26 }
  0x6e   : > { %p2521_p0 = pnand %p2519_p7, %p3346_p2  ;;  %p2528_p4 = por %p2527_p5, %p2526_p12 }
  0x6f   : > { %2290 = dma.hbm_to_vmem [thread:$0]  (!%p3343_p6), %s3345_s5, 512, %s369_s28, [#allocation9], %s3342_s18, %s3342_s18, %s3341_s12  }
  0x70   : > { %p2522_p1 = pneg %p2521_p0 }
  0x72   : > { %p2529_p8 = pnand %p2528_p4, %p2522_p1 }
  0x74   : > { %2532 = shalt.err (!%p2529_p8)
}
  0x75   : > { %2296 = dma.hbm_to_vmem [thread:$0]  (!%p3343_p6), %s3296_s9, 512, %s401_s15, [#allocation12], %s3342_s18, %s3342_s18, %s3341_s12  }
  0x76   : > { %s3347_s20 = sshll.u32 %s2695_s24, 9  ;;  %s3348_s13 = sshll.u32 %s2877_s17, 5 }
  0x77   : > { %s2959_s23 = scalar_lea.hbm %s3287_s0, %s3347_s20  ;;  %s421_s14 = scalar_lea.vmem [#allocation2], %s3348_s13 }
  0x78   : > { %s428_s26 = sshll.u32 %s421_s14, 4  ;;  %s2068_s28 = sshll.u32 %s2877_s17, 2  ;;  %s2963_s26 = int_to_ptr.vmem [resolvable:$true] %s428_s26 }
  0x79   : > { %s418_s7 = scalar_lea.sflag [#allocation3], %s2877_s17  ;;  %s2533_s1 = scalar_lea.hbm %s2959_s23, 512 }
  0x7a   : > { %p2534_p11 = scmp.ne.s32.totalorder %s2959_s23, %s2533_s1  ;;  %s2538_s20 = scalar_lea.hbm %s3287_s0, 1024 }
  0x7b   : > { %p2539_p3 = scmp.lt.s32.totalorder %s2959_s23, %s3287_s0  ;;  %p2540_p7 = scmp.lt.s32.totalorder %s2538_s20, %s2533_s1 }
  0x7c   : > { %p2536_p6 = pnand %p2534_p11, %p2905_p13 }
  0x7d   : > { %p2541_p2 = por %p2540_p7, %p2539_p3 }
  0x7e   : > { %p2537_p10 = pneg %p2536_p6 }
  0x80   : > { %p2542_p0 = pnand %p2541_p2, %p2537_p10 }
  0x82   : > { %2545 = shalt.err (!%p2542_p0)
}
  0x83   : > { %s2546_s13 = scalar_lea.vmem %s2963_s26, 512  ;;  %s2704_s14 = smov [#allocation2]  }
  0x84   : > { %p2547_p1 = scmp.ne.s32.totalorder %s2963_s26, %s2546_s13  ;;  %s2551_s5 = sshll.u32 %s2704_s14, 4  ;;  %s2552_s5 = int_to_ptr.vmem [resolvable:$false] %s2551_s5 }
  0x85   : > { %s2553_s15 = scalar_lea.vmem %s2552_s5, 1024  ;;  %p2554_p4 = scmp.lt.s32.totalorder %s2963_s26, %s2552_s5 }
  0x86   : > { %p2549_p12 = pnand %p2547_p1, %p2905_p13  ;;  %p2555_p8 = scmp.lt.s32.totalorder %s2553_s15, %s2546_s13 }
  0x88   : > { %p2550_p5 = pneg %p2549_p12  ;;  %p2556_p11 = por %p2555_p8, %p2554_p4 }
  0x8a   : > { %p2557_p6 = pnand %p2556_p11, %p2550_p5 }
  0x8c   : > { %2560 = shalt.err (!%p2557_p6)
}
  0x8d   : > { %2300 = dma.hbm_to_vmem [thread:$0]  (!%p2881_p9), %s2959_s23, 512, %s2963_s26, %s418_s7, %s3342_s18, %s3342_s18, %s3341_s12  }
  0x8e   : > { %s2123_s1 = sshll.u32 %s2695_s24, 6  ;;  %s463_s13 = scalar_lea.vmem [#allocation7], %s2068_s28 }
  0x8f   : > { %s2994_s16 = scalar_lea.hbm %s3289_s2, %s2123_s1  ;;  %s470_s14 = sshll.u32 %s463_s13, 4  ;;  %s2998_s14 = int_to_ptr.vmem [resolvable:$true] %s470_s14 }
  0x90   : > { %s2561_s5 = scalar_lea.hbm %s2994_s16, 64  ;;  %s2566_s23 = scalar_lea.hbm %s3289_s2, 128 }
  0x91   : > { %p2562_p10 = scmp.ne.s32.totalorder %s2994_s16, %s2561_s5  ;;  %p2567_p2 = scmp.lt.s32.totalorder %s2994_s16, %s3289_s2 }
  0x92   : > { %p2568_p0 = scmp.lt.s32.totalorder %s2566_s23, %s2561_s5 }
  0x93   : > { %p2564_p3 = pnand %p2562_p10, %p2905_p13 }
  0x94   : > { %p2569_p1 = por %p2568_p0, %p2567_p2 }
  0x95   : > { %p2565_p7 = pneg %p2564_p3 }
  0x97   : > { %p2570_p12 = pnand %p2569_p1, %p2565_p7 }
  0x99   : > { %2573 = shalt.err (!%p2570_p12)
}
  0x9a   : > { %s2574_s17 = scalar_lea.vmem %s2998_s14, 64  ;;  %s2705_s28 = smov [#allocation7]  }
  0x9b   : > { %p2575_p5 = scmp.ne.s32.totalorder %s2998_s14, %s2574_s17  ;;  %s2579_s15 = sshll.u32 %s2705_s28, 4  ;;  %s2580_s15 = int_to_ptr.vmem [resolvable:$false] %s2579_s15 }
  0x9c   : > { %s2581_s1 = scalar_lea.vmem %s2580_s15, 128  ;;  %p2582_p11 = scmp.lt.s32.totalorder %s2998_s14, %s2580_s15 }
  0x9d   : > { %p2577_p4 = pnand %p2575_p5, %p2905_p13  ;;  %p2583_p6 = scmp.lt.s32.totalorder %s2581_s1, %s2574_s17 }
  0x9f   : > { %p2578_p8 = pneg %p2577_p4  ;;  %p2584_p10 = por %p2583_p6, %p2582_p11 }
  0xa1   : > { %p2585_p3 = pnand %p2584_p10, %p2578_p8 }
  0xa3   : > { %2588 = shalt.err (!%p2585_p3)
}
  0xa4   : > { %s2706_s20 = smov 16   ;;  %s2707_s11 = smov 1  }
  0xa5   : > { %2306 = dma.hbm_to_vmem [thread:$0]  (!%p2881_p9), %s2994_s16, 64, %s2998_s14, %s2899_s21, %s2706_s20, %s2706_s20, %s2707_s11  }
  0xa6   : > { %p3349_p13 = scmp.ne.s32.totalorder %s3331_s29, 0 }
  0xa7   : > { %s3024_s3 = sand.u32 (!%p3349_p13), 1, %s2687_s22   ;;  %p3350_p7 = scmp.ne.s32.totalorder (!%p3349_p13), %s3328_s27, 0 }
  0xa8   : > { %482 = sbr.rel (%p3349_p13) target bundleno = 1099 (0x44b), region = 64  ;;  %s3027_s13 = sshll.u32 (!%p3349_p13), %s3024_s3, 5 }
  0xa9   : > { %s485_s5 = scalar_lea.sflag (!%p3349_p13), [#allocation3], %s3024_s3  ;;  %s488_s12 = scalar_lea.vmem (!%p3349_p13), [#allocation2], %s3027_s13 }
  0xad   : > { %2658 = dma.done.wait (%p3350_p7), %s485_s5, 512  }
  0xae   : > { %2660 = vsyncadd (%p3350_p7), %s485_s5, 4294966784  ;;  %s493_s21 = sand.u32 1, %s2801_s25   ;;  %s3037_s19 = scalar_lea.vmem [#allocation5], %s3027_s13 }
  0xaf   : > { %s494_s29 = scalar_lea.sflag [#allocation6], %s493_s21 }
  0xb0   : > { %2662 = dma.done.wait (%p3350_p7), %s494_s29, 576  }
  0xb1   : > { %2664 = vsyncadd (%p3350_p7), %s494_s29, 4294966720  ;;  %s2074_s16 = sshll.u32 %s3024_s3, 2  ;;  %p3351_p9 = scmp.eq.s32.totalorder %s2801_s25, 0 }
  0xb2   : > { %s3044_s14 = scalar_lea.vmem [#allocation7], %s2074_s16 }
  0xb3   : > { %2666 = dma.done.wait (%p3351_p9), [#allocation9], 768   ;;  %p3352_p2 = pmov %p3351_p9 }
  0xb5   : > { %2668 = vsyncadd (%p3352_p2), [#allocation9], 4294966528  ;;  %p3353_p0 = pmov %p3352_p2 }
  0xb7   : > { %2670 = dma.done.wait (%p3353_p0), [#allocation12], 768   ;;  %p3354_p1 = pmov %p3353_p0 }
  0xb8   : > { %vm600_vm0 = vcmask 130048   ;;  %v592_v0 = vld [vmem:[#allocation8 + $0x8] sm:$0xff]  ;;  %v591_v1 = vld [vmem:[#allocation8] sm:$0xff]  ;;  %v583_v2 = vld [vmem:[%s488_s12] sm:$0xff]  ;;  %vm713_vm1 = vcmask 261120   ;;  %v2708_v46 = vmov 0.0  }
  0xb9   : > { %2672 = vsyncadd (%p3354_p1), [#allocation12], 4294966528  ;;  %2170 = vmatprep.subr.mxu0 %v592_v0  ;;  %2174 = vmatprep.mubr.msk.f32.mxu0 %vm600_vm0, %v583_v2  ;;  %v584_v3 = vld [vmem:[%s488_s12 + $0x8] sm:$0xff]  ;;  %v812_v4 = vld [vmem:[#allocation11 + $0x8] sm:$0xff]  ;;  %vm2709_vm2 = vmmov 0   ;;  %vm1457_vm8 = vcmask 64512  }
  0xba   : > { %2171 = vmatpush3.msra.mxu0 %v592_v0  ;;  %v585_v5 = vld [vmem:[%s488_s12 + $0x10] sm:$0xff]  ;;  %v811_v6 = vld [vmem:[#allocation11] sm:$0xff]  ;;  %v587_v8 = vld [vmem:[%s3037_s19] sm:$0xff]  ;;  %s570_s1 = scalar_lea.vmem [#allocation14], %s3027_s13  ;;  %s2124_s20 = sshll.u32 %s2801_s25, 9 }
  0xbb   : > { %2172 = vmatprep.subr.mxu0 %v591_v1  ;;  %v586_v7 = vld [vmem:[%s488_s12 + $0x18] sm:$0xff]  ;;  %v588_v9 = vld [vmem:[%s3037_s19 + $0x8] sm:$0xff]  ;;  %v589_v10 = vld [vmem:[%s3037_s19 + $0x10] sm:$0xff]  ;;  %s1853_s11 = sshll.u32 %s570_s1, 4  ;;  %s3355_s21 = sld [smem:[#allocation32_spill]]  ;;  %s3203_s11 = int_to_ptr.vmem [resolvable:$true] %s1853_s11 }
  0xbc   : > { %2173 = vmatpush3.msra.mxu0 %v591_v1  ;;  %v590_v11 = vld [vmem:[%s3037_s19 + $0x18] sm:$0xff]  ;;  %v705_v12 = vld [vmem:[#allocation10 + $0x18] sm:$0xff]  ;;  %v704_v13 = vld [vmem:[#allocation10 + $0x10] sm:$0xff]  ;;  %s1835_s16 = scalar_lea.sflag [#allocation4], %s3024_s3  ;;  %p3357_p5 = scmp.ne.s32.totalorder %s3336_s30, 0 }
  0xbd   : > { %2175 = vmatmul.mubr.msk.f32.vlgmr.msra.gmra.mxu0 %vm600_vm0, %v584_v3  ;;  %2194 = vmatprep.subr.mxu0 %v812_v4  ;;  %v703_v14 = vld [vmem:[#allocation10 + $0x8] sm:$0xff]  ;;  %v702_v15 = vld [vmem:[#allocation10] sm:$0xff]  ;;  %v922_v32 = vld [vmem:[#allocation13 + $0x8] sm:$0xff]  ;;  %s2711_s27 = smov [#allocation14]  }
  0xbe   : > { %2177 = vmatprep.mubr.msk.f32.mxu0 %vm600_vm0, %v585_v5  ;;  %2195 = vmatpush3.msra.mxu0 %v812_v4  ;;  %v924_v16 = vld [vmem:[#allocation13 + $0x18] sm:$0xff]  ;;  %v923_v29 = vld [vmem:[#allocation13 + $0x10] sm:$0xff]  ;;  %v921_v37 = vld [vmem:[#allocation13] sm:$0xff]  ;;  %s2593_s18 = sshll.u32 %s2711_s27, 4  ;;  %s2594_s18 = int_to_ptr.vmem [resolvable:$false] %s2593_s18 }
  0xbf   : > { %2196 = vmatprep.subr.mxu0 %v811_v6  ;;  %2180 = vmatprep.subr.mxu1 %v705_v12  ;;  %v2081_v17 = vld [vmem:[%s3291_s4] ss:$0 sm:$0xff]  ;;  %s2595_s23 = scalar_lea.vmem %s2594_s18, 1024  ;;  %p2596_p11 = scmp.lt.s32.totalorder %s3203_s11, %s2594_s18 }
  0xc0   : > { %2197 = vmatpush3.msra.mxu0 %v811_v6  ;;  %2181 = vmatpush3.msra.mxu1 %v705_v12  ;;  %v2091_v28 = vld [vmem:[%s3295_s8] ss:$0 sm:$0xff] }
  0xc1   : > { %2178 = vmatmul.mubr.msk.f32.gmra.mxu0 %vm600_vm0, %v586_v7  ;;  %2182 = vmatprep.subr.mxu1 %v704_v13  ;;  %v2086_v47 = vld [vmem:[%s3293_s6] ss:$0 sm:$0xff]  ;;  %s3356_s29 = smov %s3355_s21  ;;  %s3201_s19 = scalar_lea.hbm %s3355_s21, %s2124_s20 }
  0xc2   : > { %2198 = vmatprep.mubr.msk.f32.mxu0 %vm600_vm0, %v587_v8  ;;  %2183 = vmatpush3.msra.mxu1 %v704_v13  ;;  %v2096_v59 = vld [vmem:[%s3297_s10] ss:$0 sm:$0xff] }
  0xc3   : > { %2184 = vmatprep.subr.mxu1 %v703_v14  ;;  %2218 = vmatprep.subr.mxu0 %v2708_v46 }
  0xc4   : > { %2185 = vmatpush3.msra.mxu1 %v703_v14 }
  0xc5   : > { %2199 = vmatmul.mubr.msk.f32.vlgmr.msra.gmra.mxu0 %vm600_vm0, %v588_v9  ;;  %2186 = vmatprep.subr.mxu1 %v702_v15 }
  0xc6   : > { %2201 = vmatprep.mubr.msk.f32.mxu0 %vm600_vm0, %v589_v10  ;;  %2187 = vmatpush3.msra.mxu1 %v702_v15 }
  0xc7   : > { %2204 = vmatprep.subr.mxu1 %v924_v16 }
  0xc9   : > { %2202 = vmatmul.mubr.msk.f32.gmra.mxu0 %vm600_vm0, %v590_v11 }
  0xca   : > { %2220 = vmatprep.mubr.msk.f32.mxu0 %vm2709_vm2, %v2708_v46 }
 0x17d   : > { %v2176_v18 = vpop.f32.mrf.mxu0 }
 0x17e   : > { %v685_v19 = vadd.f32 %v2176_v18, %v2081_v17 }
 0x17f   : > { %v679_v20 = vpop.f32.mrf.mxu0 }
 0x180   : > { %v680_v21 = vadd.f32 %v2081_v17, %v679_v20  ;;  %v699_v24 = vmax.f32 %v685_v19, 0.0 }
 0x181   : > { %v2179_v22 = vpop.f32.mrf.mxu0 }
 0x182   : > { %v698_v23 = vmax.f32 %v680_v21, 0.0  ;;  %v695_v25 = vadd.f32 %v2179_v22, %v2081_v17 }
 0x183   : > { %v689_v26 = vpop.f32.mrf.mxu0 }
 0x184   : > { %v690_v27 = vadd.f32 %v2081_v17, %v689_v26  ;;  %2188 = vmatprep.mubr.msk.f32.mxu1 %vm713_vm1, %v698_v23  ;;  %v701_v33 = vmax.f32 %v695_v25, 0.0 }
 0x185   : > { %2189 = vmatmul.mubr.msk.f32.vlgmr.msra.gmra.mxu1 %vm713_vm1, %v699_v24  ;;  %v2200_v30 = vpop.f32.mrf.mxu0 }
 0x186   : > { %v700_v31 = vmax.f32 %v690_v27, 0.0  ;;  %2205 = vmatpush3.msra.mxu1 %v924_v16  ;;  %v904_v34 = vadd.f32 %v2200_v30, %v2091_v28 }
 0x187   : > { %v898_v35 = vpop.f32.mrf.mxu0  ;;  %2206 = vmatprep.subr.mxu1 %v923_v29 }
 0x188   : > { %v899_v36 = vadd.f32 %v2091_v28, %v898_v35  ;;  %2191 = vmatprep.mubr.msk.f32.mxu1 %vm713_vm1, %v700_v31  ;;  %2207 = vmatpush3.msra.mxu1 %v923_v29  ;;  %v918_v41 = vmax.f32 %v904_v34, 0.0 }
 0x189   : > { %2192 = vmatmul.mubr.msk.f32.gmra.mxu1 %vm713_vm1, %v701_v33  ;;  %v2203_v38 = vpop.f32.mrf.mxu0  ;;  %2208 = vmatprep.subr.mxu1 %v922_v32 }
 0x18a   : > { %v917_v39 = vmax.f32 %v899_v36, 0.0  ;;  %v914_v40 = vadd.f32 %v2203_v38, %v2091_v28  ;;  %2209 = vmatpush3.msra.mxu1 %v922_v32 }
 0x18b   : > { %v908_v42 = vpop.f32.mrf.mxu0  ;;  %2210 = vmatprep.subr.mxu1 %v921_v37 }
 0x18c   : > { %v909_v43 = vadd.f32 %v2091_v28, %v908_v42  ;;  %2211 = vmatpush3.msra.mxu1 %v921_v37  ;;  %2212 = vmatprep.mubr.msk.f32.mxu1 %vm713_vm1, %v917_v39  ;;  %v920_v44 = vmax.f32 %v914_v40, 0.0 }
 0x18d   : > { %2213 = vmatmul.mubr.msk.f32.vlgmr.msra.gmra.mxu1 %vm713_vm1, %v918_v41  ;;  %2228 = vmatprep.subr.mxu1 %v2708_v46 }
 0x18e   : > { %v919_v45 = vmax.f32 %v909_v43, 0.0 }
 0x190   : > { %2215 = vmatprep.mubr.msk.f32.mxu1 %vm713_vm1, %v919_v45 }
 0x191   : > { %2216 = vmatmul.mubr.msk.f32.gmra.mxu1 %vm713_vm1, %v920_v44 }
 0x192   : > { %2230 = vmatprep.mubr.msk.f32.mxu1 %vm2709_vm2, %v2708_v46 }
 0x245   : > { %v2190_v48 = vpop.f32.mrf.mxu1 }
 0x246   : > { %v3089_v49 = vadd.f32 %v2190_v48, %v2086_v47 }
 0x247   : > { %v792_v50 = vpop.f32.mrf.mxu1 }
 0x248   : > { %v1030_v51 = vmul.f32 %v3089_v49, %v3089_v49  ;;  %v3093_v52 = vadd.f32 %v2086_v47, %v792_v50 }
 0x249   : > { %v2193_v53 = vpop.f32.mrf.mxu1 }
 0x24a   : > { %v1040_v54 = vsel %vm713_vm1, %v1030_v51, 0.0  ;;  %v1029_v55 = vmul.f32 %v3093_v52, %v3093_v52  ;;  %v3098_v56 = vadd.f32 %v2193_v53, %v2086_v47 }
 0x24b   : > { %v1041_v57 = vrot.slane %v1040_v54, 4  ;;  %v802_v58 = vpop.f32.mrf.mxu1 }
 0x24c   : > { %v1033_v60 = vsel %vm713_vm1, %v1029_v55, 0.0  ;;  %v1032_v61 = vmul.f32 %v3098_v56, %v3098_v56  ;;  %v3106_v62 = vadd.f32 %v2086_v47, %v802_v58 }
 0x24d   : > { %v1034_v63 = vrot.slane %v1033_v60, 4  ;;  %v2214_v0 = vpop.f32.mrf.mxu1  ;;  %v1042_v4 = vadd.f32 %v1041_v57, %v1040_v54 }
 0x24e   : > { %v1054_v1 = vsel %vm713_vm1, %v1032_v61, 0.0  ;;  %v1031_v2 = vmul.f32 %v3106_v62, %v3106_v62  ;;  %v3111_v3 = vadd.f32 %v2214_v0, %v2096_v59 }
 0x24f   : > { %v1035_v5 = vadd.f32 %v1034_v63, %v1033_v60  ;;  %v1010_v6 = vpop.f32.mrf.mxu1  ;;  %v1055_v11 = vrot.slane %v1054_v1, 4  ;;  %v1043_v17 = vrot.slane %v1042_v4, 2 }
 0x250   : > { %v1047_v7 = vsel %vm713_vm1, %v1031_v2, 0.0  ;;  %v1074_v8 = vmul.f32 %v3111_v3, %v3111_v3  ;;  %v3116_v9 = vadd.f32 %v2096_v59, %v1010_v6 }
 0x251   : > { %v1036_v10 = vrot.slane %v1035_v5, 2  ;;  %v1048_v12 = vrot.slane %v1047_v7, 4  ;;  %v2217_v13 = vpop.f32.mrf.mxu1  ;;  %v1056_v25 = vadd.f32 %v1055_v11, %v1054_v1  ;;  %v1044_v31 = vadd.f32 %v1043_v17, %v1042_v4 }
 0x252   : > { %v1084_v14 = vsel %vm713_vm1, %v1074_v8, 0.0  ;;  %v1073_v15 = vmul.f32 %v3116_v9, %v3116_v9  ;;  %v3121_v16 = vadd.f32 %v2217_v13, %v2096_v59 }
 0x253   : > { %v1049_v18 = vadd.f32 %v1048_v12, %v1047_v7  ;;  %v1020_v19 = vpop.f32.mrf.mxu1  ;;  %v1085_v20 = vrot.slane %v1084_v14, 4  ;;  %v1037_v24 = vadd.f32 %v1036_v10, %v1035_v5  ;;  %v1057_v37 = vrot.slane %v1056_v25, 2 }
 0x254   : > { %v1077_v21 = vsel %vm713_vm1, %v1073_v15, 0.0  ;;  %v1076_v22 = vmul.f32 %v3121_v16, %v3121_v16  ;;  %v3126_v23 = vadd.f32 %v2096_v59, %v1020_v19  ;;  %v1045_v43 = vrot.slane %v1044_v31, 1 }
 0x255   : > { %v1050_v26 = vrot.slane %v1049_v18, 2  ;;  %v1086_v27 = vadd.f32 %v1085_v20, %v1084_v14  ;;  %v1078_v28 = vrot.slane %v1077_v21, 4  ;;  %v1038_v36 = vrot.slane %v1037_v24, 1 }
 0x256   : > { %v1098_v29 = vsel %vm713_vm1, %v1076_v22, 0.0  ;;  %v1075_v30 = vmul.f32 %v3126_v23, %v3126_v23  ;;  %v1058_v51 = vadd.f32 %v1057_v37, %v1056_v25  ;;  %v1046_v59 = vadd.f32 %v1045_v43, %v1044_v31 }
 0x257   : > { %v1087_v32 = vrot.slane %v1086_v27, 2  ;;  %v1079_v33 = vadd.f32 %v1078_v28, %v1077_v21  ;;  %v1099_v34 = vrot.slane %v1098_v29, 4  ;;  %v1051_v38 = vadd.f32 %v1050_v26, %v1049_v18 }
 0x258   : > { %v1091_v35 = vsel %vm713_vm1, %v1075_v30, 0.0  ;;  %v1039_v50 = vadd.f32 %v1038_v36, %v1037_v24  ;;  %v1059_v1 = vrot.slane %v1058_v51, 1  ;;  %v1062_v8 = vmax.f32 %v1046_v59, 1e-24  ;;  %v1423_v30 = vld [vmem:[%s3044_s14 + $0x2] sm:$0x1] }
 0x259   : > { %v1088_v39 = vadd.f32 %v1087_v32, %v1086_v27  ;;  %v1080_v40 = vrot.slane %v1079_v33, 2  ;;  %v1100_v41 = vadd.f32 %v1099_v34, %v1098_v29  ;;  %v1092_v42 = vrot.slane %v1091_v35, 4  ;;  %v1422_v29 = vld [vmem:[%s3044_s14 + $0x1] sm:$0x1]  ;;  %v1424_v34 = vld [vmem:[%s3044_s14 + $0x3] sm:$0x1] }
 0x25a   : > { %v1052_v53 = vrot.slane %v1051_v38, 1  ;;  %v1061_v0 = vmax.f32 %v1039_v50, 1e-24  ;;  %v1060_v11 = vadd.f32 %v1059_v1, %v1058_v51  ;;  %v2710_v32 = vmov 0  }
 0x25b   : > { %v1089_v44 = vrot.slane %v1088_v39, 1  ;;  %v1081_v45 = vadd.f32 %v1080_v40, %v1079_v33  ;;  %v1101_v47 = vrot.slane %v1100_v41, 2  ;;  %v1093_v48 = vadd.f32 %v1092_v42, %v1091_v35 }
 0x25c   : > { %v1053_v2 = vadd.f32 %v1052_v53, %v1051_v38  ;;  %v1064_v15 = vmax.f32 %v1060_v11, 1e-24  ;;  %vm1426_vm4 = vcmp.eq.s32.totalorder %v1422_v29, 1  ;;  %vm1427_vm5 = vcmp.eq.s32.totalorder %v1423_v30, 1 }
 0x25d   : > { %v1090_v54 = vadd.f32 %v1089_v44, %v1088_v39  ;;  %v1082_v55 = vrot.slane %v1081_v45, 1  ;;  %v1102_v57 = vadd.f32 %v1101_v47, %v1100_v41  ;;  %v1094_v58 = vrot.slane %v1093_v48, 2 }
 0x25e   : > { %v1063_v12 = vmax.f32 %v1053_v2, 1e-24  ;;  %v1430_v36 = vsel %vm1426_vm4, 1, %v2710_v32  ;;  %v1431_v37 = vsel %vm1427_vm5, 1, %v2710_v32  ;;  %vm1428_vm6 = vcmp.eq.s32.totalorder %v1424_v34, 1 }
 0x25f   : > { %v1083_v60 = vadd.f32 %v1082_v55, %v1081_v45  ;;  %v1103_v61 = vrot.slane %v1102_v57, 1  ;;  %v1095_v63 = vadd.f32 %v1094_v58, %v1093_v48  ;;  %v1106_v4 = vmax.f32 %v1090_v54, 1e-24 }
 0x260   : > { %v1432_v40 = vsel %vm1428_vm6, 1, %v2710_v32 }
 0x261   : > { %v1105_v5 = vmax.f32 %v1083_v60, 1e-24  ;;  %v1104_v6 = vadd.f32 %v1103_v61, %v1102_v57  ;;  %v1096_v7 = vrot.slane %v1095_v63, 1 }
 0x263   : > { %2369 = vrsqrt.f32 %v1105_v5  ;;  %v1097_v10 = vadd.f32 %v1096_v7, %v1095_v63  ;;  %v1108_v13 = vmax.f32 %v1104_v6, 1e-24 }
 0x264   : > { %2371 = vrsqrt.f32 %v1061_v0 }
 0x265   : > { %2373 = vrsqrt.f32 %v1106_v4  ;;  %v1107_v14 = vmax.f32 %v1097_v10, 1e-24 }
 0x266   : > { %2375 = vrsqrt.f32 %v1062_v8 }
 0x267   : > { %2377 = vrsqrt.f32 %v1107_v14 }
 0x268   : > { %2379 = vrsqrt.f32 %v1063_v12 }
 0x269   : > { %2381 = vrsqrt.f32 %v1108_v13 }
 0x26a   : > { %2383 = vrsqrt.f32 %v1064_v15 }
 0x270   : > { %v2370_v17 = vpop.eup %2369 }
 0x271   : > { %v2372_v18 = vpop.eup %2371  ;;  %v1113_v19 = vmul.f32 %v2370_v17, %v3116_v9 }
 0x272   : > { %v2374_v20 = vpop.eup %2373  ;;  %v1069_v24 = vmul.f32 %v2372_v18, %v3093_v52 }
 0x273   : > { %v2376_v21 = vpop.eup %2375  ;;  %2219 = vmatpush3.xpose.msk.msra.mxu0 %vm713_vm1, %v1113_v19  ;;  %v1114_v26 = vmul.f32 %v2374_v20, %v3111_v3 }
 0x274   : > { %v2378_v22 = vpop.eup %2377  ;;  %2223 = vmatprep.subr.mxu0 %v2708_v46  ;;  %v1070_v9 = vmul.f32 %v2376_v21, %v3089_v49 }
 0x275   : > { %v2380_v25 = vpop.eup %2379  ;;  %v3138_v27 = vmul.f32 %v2378_v22, %v3126_v23 }
 0x276   : > { %v2382_v28 = vpop.eup %2381  ;;  %2221 = vmatmul.mubr.msk.f32.vlgmr.msra.gmra.mxu0 %vm713_vm1, %v1069_v24  ;;  %v1071_v52 = vmul.f32 %v2380_v25, %v3106_v62  ;;  %v1421_v62 = vld [vmem:[%s3044_s14] sm:$0x1]  ;;  %s2589_s14 = scalar_lea.vmem %s3203_s11, 512 }
 0x277   : > { %2224 = vmatpush3.xpose.msk.msra.mxu0 %vm713_vm1, %v1114_v26  ;;  %2229 = vmatpush3.xpose.msk.msra.mxu1 %vm713_vm1, %v3138_v27  ;;  %v2384_v3 = vpop.eup %2383  ;;  %v3150_v23 = vmul.f32 %v2382_v28, %v3121_v16  ;;  %vm1425_vm3 = vcmp.eq.s32.totalorder %v1421_v62, 1  ;;  %p2590_p12 = scmp.ne.s32.totalorder %s3203_s11, %s2589_s14  ;;  %p2597_p6 = scmp.lt.s32.totalorder %s2595_s23, %s2589_s14 }
 0x278   : > { %2225 = vmatprep.mubr.msk.f32.mxu0 %vm2709_vm2, %v2708_v46  ;;  %2233 = vmatprep.subr.mxu0 %v2708_v46  ;;  %v1072_v49 = vmul.f32 %v2384_v3, %v3098_v56  ;;  %v1433_v56 = vlaneseq  ;;  %v1429_v33 = vsel %vm1425_vm3, 1, %v2710_v32 }
 0x279   : > { %2238 = vmatprep.subr.mxu1 %v2708_v46  ;;  %p2591_p4 = pnand %p2590_p12, %p3357_p5  ;;  %p2598_p10 = por %p2597_p6, %p2596_p11 }
 0x27a   : > { %2226 = vmatmul.mubr.msk.f32.vlgmr.msra.gmra.mxu0 %vm713_vm1, %v1070_v9  ;;  %2231 = vmatmul.mubr.msk.f32.vlgmr.msra.gmra.mxu1 %vm713_vm1, %v1071_v52  ;;  %v1434_v16 = vshrl.u32 %v1433_v56, 7 }
 0x27b   : > { %2234 = vmatpush3.xpose.msk.msra.mxu0 %vm713_vm1, %v3150_v23  ;;  %2239 = vmatpush3.msra.mxu1 %v1113_v19  ;;  %p2592_p8 = pneg %p2591_p4 }
 0x27c   : > { %2235 = vmatprep.mubr.msk.f32.mxu0 %vm2709_vm2, %v2708_v46  ;;  %2243 = vmatprep.subr.mxu0 %v2708_v46  ;;  %v1435_v31 = vsub.s32 0, %v1434_v16 }
 0x27d   : > { %2240 = vmatprep.mubr.msk.f32.mxu1 %vm2709_vm2, %v2708_v46  ;;  %2248 = vmatprep.subr.mxu1 %v2708_v46  ;;  %p2599_p3 = pnand %p2598_p10, %p2592_p8 }
 0x27e   : > { %2236 = vmatmul.mubr.msk.f32.vlgmr.msra.gmra.mxu0 %vm713_vm1, %v1072_v49  ;;  %v1436_v35 = vrot.slane %v1429_v33, %v1435_v31  ;;  %v1440_v38 = vrot.slane %v1430_v36, %v1435_v31  ;;  %v1444_v39 = vrot.slane %v1431_v37, %v1435_v31  ;;  %v1448_v45 = vrot.slane %v1432_v40, %v1435_v31 }
 0x27f   : > { %2244 = vmatpush3.msra.mxu0 %v1114_v26  ;;  %2245 = vmatprep.mubr.msk.f32.mxu0 %vm2709_vm2, %v2708_v46 }
 0x280   : > { %2253 = vmatprep.subr.mxu0 %v2708_v46  ;;  %vm1449_vm7 = vcmp.eq.s32.totalorder %v1436_v35, 1  ;;  %vm1450_vm9 = vcmp.eq.s32.totalorder %v1440_v38, 1  ;;  %vm1451_vm10 = vcmp.eq.s32.totalorder %v1444_v39, 1  ;;  %vm1452_vm11 = vcmp.eq.s32.totalorder %v1448_v45, 1 }
 0x336   : > { %v1189_v41 = vpop.f32.mrf.mxu0 }
 0x337   : > { %v1453_v42 = vsel %vm1449_vm7, -1e+32, %v1189_v41 }
 0x338   : > { %v1458_v43 = vsel %vm1457_vm8, %v1453_v42, -inf  ;;  %v2222_v44 = vpop.f32.mrf.mxu0 }
 0x339   : > { %v1459_v47 = vrot.slane %v1458_v43, 4 }
 0x33a   : > { %v1265_v48 = vpop.f32.mrf.mxu0  ;;  %v1341_v50 = vpop.f32.mrf.mxu1 }
 0x33b   : > { %v1460_v51 = vmax.f32 %v1458_v43, %v1459_v47  ;;  %v1454_v53 = vsel %vm1450_vm9, -1e+32, %v1265_v48  ;;  %v1455_v54 = vsel %vm1451_vm10, -1e+32, %v1341_v50 }
 0x33c   : > { %v1465_v55 = vsel %vm1457_vm8, %v1454_v53, -inf  ;;  %v1472_v57 = vsel %vm1457_vm8, %v1455_v54, -inf  ;;  %v2227_v58 = vpop.f32.mrf.mxu0  ;;  %v2232_v59 = vpop.f32.mrf.mxu1 }
 0x33d   : > { %v1461_v60 = vrot.slane %v1460_v51, 2  ;;  %v1466_v61 = vrot.slane %v1465_v55, 4  ;;  %v1473_v63 = vrot.slane %v1472_v57, 4 }
 0x33e   : > { %v1417_v0 = vpop.f32.mrf.mxu0 }
 0x33f   : > { %v1462_v1 = vmax.f32 %v1460_v51, %v1461_v60  ;;  %v1467_v2 = vmax.f32 %v1465_v55, %v1466_v61  ;;  %v1474_v4 = vmax.f32 %v1472_v57, %v1473_v63  ;;  %v1456_v5 = vsel %vm1452_vm11, -1e+32, %v1417_v0 }
 0x340   : > { %v1479_v6 = vsel %vm1457_vm8, %v1456_v5, -inf  ;;  %v2237_v7 = vpop.f32.mrf.mxu0 }
 0x341   : > { %v1463_v8 = vrot.slane %v1462_v1, 1  ;;  %v1468_v10 = vrot.slane %v1467_v2, 2  ;;  %v1475_v11 = vrot.slane %v1474_v4, 2  ;;  %v1480_v12 = vrot.slane %v1479_v6, 4 }
 0x343   : > { %v1464_v13 = vmax.f32 %v1462_v1, %v1463_v8  ;;  %v1469_v14 = vmax.f32 %v1467_v2, %v1468_v10  ;;  %v1476_v15 = vmax.f32 %v1474_v4, %v1475_v11  ;;  %v1481_v17 = vmax.f32 %v1479_v6, %v1480_v12 }
 0x345   : > { %v1486_v18 = vsub.f32 %v1453_v42, %v1464_v13  ;;  %v1470_v19 = vrot.slane %v1469_v14, 1  ;;  %v1477_v20 = vrot.slane %v1476_v15, 1  ;;  %v1482_v21 = vrot.slane %v1481_v17, 2 }
 0x347   : > { %v1490_v22 = vmul.f32 1.442695, %v1486_v18  ;;  %v1471_v24 = vmax.f32 %v1469_v14, %v1470_v19  ;;  %v1478_v25 = vmax.f32 %v1476_v15, %v1477_v20  ;;  %v1483_v26 = vmax.f32 %v1481_v17, %v1482_v21 }
 0x349   : > { %2385 = vpow2.f32 %v1490_v22  ;;  %v1487_v28 = vsub.f32 %v1454_v53, %v1471_v24  ;;  %v1488_v9 = vsub.f32 %v1455_v54, %v1478_v25  ;;  %v1484_v52 = vrot.slane %v1483_v26, 1 }
 0x34b   : > { %v1492_v3 = vmul.f32 1.442695, %v1487_v28  ;;  %v1494_v49 = vmul.f32 1.442695, %v1488_v9  ;;  %v1485_v56 = vmax.f32 %v1483_v26, %v1484_v52 }
 0x34d   : > { %2387 = vpow2.f32 %v1492_v3  ;;  %v1489_v62 = vsub.f32 %v1456_v5, %v1485_v56 }
 0x34e   : > { %2389 = vpow2.f32 %v1494_v49 }
 0x34f   : > { %v1496_v16 = vmul.f32 1.442695, %v1489_v62 }
 0x351   : > { %2391 = vpow2.f32 %v1496_v16 }
 0x356   : > { %v2386_v29 = vpop.eup %2385 }
 0x357   : > { %v1498_v30 = vsel %vm1457_vm8, %v2386_v29, 0.0 }
 0x358   : > { %v1499_v31 = vrot.slane %v1498_v30, 4 }
 0x35a   : > { %v2388_v32 = vpop.eup %2387  ;;  %v1500_v33 = vadd.f32 %v1499_v31, %v1498_v30 }
 0x35b   : > { %v2390_v34 = vpop.eup %2389  ;;  %v1505_v35 = vsel %vm1457_vm8, %v2388_v32, 0.0 }
 0x35c   : > { %v1501_v36 = vrot.slane %v1500_v33, 2  ;;  %v1506_v37 = vrot.slane %v1505_v35, 4  ;;  %v1512_v38 = vsel %vm1457_vm8, %v2390_v34, 0.0 }
 0x35d   : > { %v1513_v39 = vrot.slane %v1512_v38, 4 }
 0x35e   : > { %v2392_v40 = vpop.eup %2391  ;;  %v1502_v41 = vadd.f32 %v1501_v36, %v1500_v33  ;;  %v1507_v42 = vadd.f32 %v1506_v37, %v1505_v35 }
 0x35f   : > { %v1514_v43 = vadd.f32 %v1513_v39, %v1512_v38  ;;  %v1519_v44 = vsel %vm1457_vm8, %v2392_v40, 0.0 }
 0x360   : > { %v1503_v45 = vrot.slane %v1502_v41, 1  ;;  %v1508_v47 = vrot.slane %v1507_v42, 2  ;;  %v1520_v48 = vrot.slane %v1519_v44, 4 }
 0x361   : > { %v1515_v50 = vrot.slane %v1514_v43, 2 }
 0x362   : > { %v1504_v51 = vadd.f32 %v1503_v45, %v1502_v41  ;;  %v1509_v53 = vadd.f32 %v1508_v47, %v1507_v42  ;;  %v1521_v54 = vadd.f32 %v1520_v48, %v1519_v44 }
 0x363   : > { %v1516_v55 = vadd.f32 %v1515_v50, %v1514_v43 }
 0x364   : > { %2393 = vrcp.f32 %v1504_v51  ;;  %v1510_v57 = vrot.slane %v1509_v53, 1  ;;  %v1522_v58 = vrot.slane %v1521_v54, 2 }
 0x365   : > { %v1517_v59 = vrot.slane %v1516_v55, 1 }
 0x366   : > { %v1511_v60 = vadd.f32 %v1510_v57, %v1509_v53  ;;  %v1523_v61 = vadd.f32 %v1522_v58, %v1521_v54 }
 0x367   : > { %v1518_v63 = vadd.f32 %v1517_v59, %v1516_v55 }
 0x368   : > { %2395 = vrcp.f32 %v1511_v60  ;;  %v1524_v0 = vrot.slane %v1523_v61, 1 }
 0x369   : > { %2397 = vrcp.f32 %v1518_v63 }
 0x36a   : > { %v1525_v1 = vadd.f32 %v1524_v0, %v1523_v61 }
 0x36c   : > { %2399 = vrcp.f32 %v1525_v1 }
 0x371   : > { %v2394_v2 = vpop.eup %2393 }
 0x372   : > { %v1527_v4 = vmul.f32 %v2394_v2, %v2386_v29 }
 0x374   : > { %1534 = vst.msk [vmem:[%s570_s1] sm:$0xff] %vm1457_vm8, %v1527_v4  ;;  %2241 = vmatmul.mubr.msk.f32.vlgmr.msra.gmra.mxu1 %vm1457_vm8, %v1527_v4 }
 0x375   : > { %v2396_v5 = vpop.eup %2395  ;;  %2249 = vmatpush3.msra.mxu1 %v3138_v27  ;;  %2250 = vmatprep.mubr.msk.f32.mxu1 %vm2709_vm2, %v2708_v46 }
 0x376   : > { %v2398_v6 = vpop.eup %2397  ;;  %v1529_v7 = vmul.f32 %v2396_v5, %v2388_v32 }
 0x377   : > { %v1531_v8 = vmul.f32 %v2398_v6, %v2390_v34 }
 0x378   : > { %1535 = vst.msk [vmem:[%s570_s1 + $0x8] sm:$0xff] %vm1457_vm8, %v1529_v7  ;;  %2246 = vmatmul.mubr.msk.f32.vlgmr.msra.gmra.mxu0 %vm1457_vm8, %v1529_v7 }
 0x379   : > { %v2400_v10 = vpop.eup %2399  ;;  %1536 = vst.msk [vmem:[%s570_s1 + $0x10] sm:$0xff] %vm1457_vm8, %v1531_v8  ;;  %2251 = vmatmul.mubr.msk.f32.vlgmr.msra.gmra.mxu1 %vm1457_vm8, %v1531_v8  ;;  %2254 = vmatpush3.msra.mxu0 %v3150_v23 }
 0x37a   : > { %2255 = vmatprep.mubr.msk.f32.mxu0 %vm2709_vm2, %v2708_v46  ;;  %v1533_v27 = vmul.f32 %v2400_v10, %v2392_v40 }
 0x37c   : > { %1537 = vst.msk [vmem:[%s570_s1 + $0x18] sm:$0xff] %vm1457_vm8, %v1533_v27  ;;  %2256 = vmatmul.mubr.msk.f32.vlgmr.msra.gmra.mxu0 %vm1457_vm8, %v1533_v27 }
 0x37d   : > { %2602 = shalt.err (!%p2599_p3)
}
 0x37e   : > { %s2603_s26 = scalar_lea.hbm %s3201_s19, 512  ;;  %s2607_s28 = scalar_lea.hbm %s3356_s29, 1024 }
 0x37f   : > { %p2604_p13 = scmp.ne.s32.totalorder %s3201_s19, %s2603_s26  ;;  %p2608_p2 = scmp.lt.s32.totalorder %s3201_s19, %s3356_s29 }
 0x380   : > { %p2609_p0 = scmp.lt.s32.totalorder %s2607_s28, %s2603_s26 }
 0x381   : > { %p2605_p7 = pnand %p2604_p13, %p3357_p5 }
 0x382   : > { %p2610_p1 = por %p2609_p0, %p2608_p2 }
 0x383   : > { %p2606_p9 = pneg %p2605_p7 }
 0x385   : > { %p2611_p12 = pnand %p2610_p1, %p2606_p9 }
 0x387   : > { %2614 = shalt.err (!%p2611_p12)
}
 0x388   : > { %s2712_s5 = smov 128   ;;  %s2713_s12 = smov 8  }
 0x389   : > { %2280 = dma.vmem_to_hbm [thread:$0]  (%p3357_p5), %s3203_s11, 512, %s3201_s19, %s1835_s16, %s2712_s5, %s2712_s5, %s2713_s12  }
 0x38a   : > { %s577_s21 = scalar_lea.vmem [#allocation15], %s3027_s13  ;;  %s3358_s19 = sld [smem:[#allocation33_spill]] }
 0x38b   : > { %s1869_s14 = sshll.u32 %s577_s21, 4  ;;  %s1840_s27 = scalar_lea.sflag [#allocation16], %s3024_s3  ;;  %s3234_s14 = int_to_ptr.vmem [resolvable:$true] %s1869_s14 }
 0x38c   : > { %s2615_s18 = scalar_lea.vmem %s3234_s14, 512  ;;  %s2714_s23 = smov [#allocation15]  }
 0x38d   : > { %p2616_p4 = scmp.ne.s32.totalorder %s3234_s14, %s2615_s18  ;;  %s2619_s26 = sshll.u32 %s2714_s23, 4  ;;  %s2620_s26 = int_to_ptr.vmem [resolvable:$false] %s2619_s26 }
 0x38e   : > { %s2621_s7 = scalar_lea.vmem %s2620_s26, 1024  ;;  %p2622_p6 = scmp.lt.s32.totalorder %s3234_s14, %s2620_s26 }
 0x38f   : > { %p2617_p8 = pnand %p2616_p4, %p3357_p5  ;;  %p2623_p10 = scmp.lt.s32.totalorder %s2621_s7, %s2615_s18 }
 0x390   : > { %s3242_s16 = scalar_lea.hbm %s3358_s19, %s2124_s20 }
 0x391   : > { %p2618_p11 = pneg %p2617_p8  ;;  %p2624_p3 = por %p2623_p10, %p2622_p6 }
 0x393   : > { %p2625_p13 = pnand %p2624_p3, %p2618_p11 }
 0x434   : > { %v1607_v46 = vpop.f32.mrf.mxu1 }
 0x435   : > { %1830 = vst.msk [vmem:[%s577_s21] sm:$0xff] %vm713_vm1, %v1607_v46 }
 0x436   : > { %v2242_v23 = vpop.f32.mrf.mxu1 }
 0x438   : > { %v1680_v11 = vpop.f32.mrf.mxu0 }
 0x439   : > { %1831 = vst.msk [vmem:[%s577_s21 + $0x8] sm:$0xff] %vm713_vm1, %v1680_v11  ;;  %v1753_v12 = vpop.f32.mrf.mxu1 }
 0x43a   : > { %1832 = vst.msk [vmem:[%s577_s21 + $0x10] sm:$0xff] %vm713_vm1, %v1753_v12  ;;  %v2247_v13 = vpop.f32.mrf.mxu0 }
 0x43b   : > { %v2252_v14 = vpop.f32.mrf.mxu1 }
 0x43c   : > { %v1826_v15 = vpop.f32.mrf.mxu0 }
 0x43d   : > { %1833 = vst.msk [vmem:[%s577_s21 + $0x18] sm:$0xff] %vm713_vm1, %v1826_v15 }
 0x43e   : > { %v2257_v17 = vpop.f32.mrf.mxu0 }
 0x43f   : > { %2628 = shalt.err (!%p2625_p13)
}
 0x440   : > { %s2629_s25 = scalar_lea.hbm %s3242_s16, 512  ;;  %s2633_s17 = scalar_lea.hbm %s3358_s19, 1024 }
 0x441   : > { %p2630_p7 = scmp.ne.s32.totalorder %s3242_s16, %s2629_s25  ;;  %p2634_p0 = scmp.lt.s32.totalorder %s3242_s16, %s3358_s19 }
 0x442   : > { %p2635_p1 = scmp.lt.s32.totalorder %s2633_s17, %s2629_s25 }
 0x443   : > { %p2631_p9 = pnand %p2630_p7, %p3357_p5 }
 0x444   : > { %p2636_p12 = por %p2635_p1, %p2634_p0 }
 0x445   : > { %p2632_p2 = pneg %p2631_p9 }
 0x447   : > { %p2637_p4 = pnand %p2636_p12, %p2632_p2 }
 0x449   : > { %2640 = shalt.err (!%p2637_p4)
}
 0x44a   : > { %2281 = dma.vmem_to_hbm [thread:$0]  (%p3357_p5), %s3234_s14, 512, %s3242_s16, %s1840_s27, %s2712_s5, %s2712_s5, %s2713_s12  }
 0x44b PF: > { %s3359_s1 = sld [smem:[#allocation23_spill]]  ;;  %p3362_p11 = scmp.ge.s32.totalorder %s2695_s24, 2 }
 0x44c   : > { %s3360_s21 = sld [smem:[#allocation25_spill]] }
 0x451   : > { %s1884_s13 = sand.u32 1, %s3359_s1  }
 0x452   : > { %p3361_p8 = scmp.ne.s32.totalorder %s3360_s21, 0  ;;  %s1885_s11 = scalar_lea.sflag [#allocation4], %s1884_s13 }
 0x454   : > { %p2308_p6 = pnand %p3362_p11, %p3361_p8 }
 0x456   : > { %p2309_p10 = pneg %p2308_p6 }
 0x458   : > { %2674 = dma.done.wait (%p2309_p10), %s1885_s11, 512  }
 0x459   : > { %2676 = vsyncadd (%p2309_p10), %s1885_s11, 4294966784  ;;  %s1894_s18 = scalar_lea.sflag [#allocation16], %s1884_s13 }
 0x45a   : > { %2678 = dma.done.wait (%p2309_p10), %s1894_s18, 512  }
 0x45b   : > { %2680 = vsyncadd (%p2309_p10), %s1894_s18, 4294966784  ;;  %s3363_s24 = sld [smem:[#allocation26_spill]]  ;;  %s3366_s21 = smov %s2687_s22 }
 0x45c   : > { %s3364_s30 = sld [smem:[#allocation24_spill]] }
 0x45d   : > { %s3365_s23 = sld [smem:[#allocation27_spill]] }
 0x461   : > { %p34_p5 = scmp.ge.s32.totalorder %s3363_s24, 4  }
 0x462   : > { %s3367_s22 = smov %s3364_s30 }
 0x463   :  { %36 = sbr.rel (!%p34_p5) target bundleno = 18 (0x12), region = 166 }
 0x468   :  { %1899 = vsyncpa [#allocation3], 1 }
 0x469   :  { %1901 = vsyncpa [#allocation3 + $0x1], 1 }
 0x46a   :  { %1902 = vsyncpa [#allocation6], 1 }
 0x46b   :  { %1904 = vsyncpa [#allocation6 + $0x1], 1 }
 0x46c   :  { %1905 = vsyncpa [#allocation9], 1 }
 0x46d   :  { %1906 = vsyncpa [#allocation12], 1 }
 0x46e   :  { %1907 = vsyncpa [#allocation4], 1 }
 0x46f   :  { %1909 = vsyncpa [#allocation4 + $0x1], 1 }
 0x470   :  { %1910 = vsyncpa [#allocation16], 1 }
 0x471   :  { %1912 = vsyncpa [#allocation16 + $0x1], 1 }

</bundles_post_ra>
